<compile_context>
chip_gen: v7x
topology: tpu7x:2x2x1
jax: 0.10.0
libtpu: 0.0.40
codegen_flags: <defaults>
</compile_context>

<pallas_src>
import random

import jax
import jax.numpy as jnp
from jax.experimental import pallas as pl
from jax.experimental.pallas import tpu as pltpu


# ----------------------------------------------------------------------------
# Encoder: both LSTM directions fused into one single-step kernel.
# ----------------------------------------------------------------------------
def bilstm_encoder_kernel(x2d_ref, wih_ref, whh_ref, b_ref,
                          enc_ref, h0_ref, c0_ref):
    S, B, H2 = enc_ref.shape
    H = H2 // 2

    x2d = x2d_ref[...]                                    # (S*B, E)
    # Hoisted input-to-hidden projection (+bias) for the whole sequence:
    # one MXU matmul per direction instead of S tiny per-step dots.
    xg_f = (jnp.dot(x2d, wih_ref[0], preferred_element_type=jnp.float32)
            + b_ref[0])                                   # (S*B, 4H)
    xg_b = (jnp.dot(x2d, wih_ref[1], preferred_element_type=jnp.float32)
            + b_ref[1])                                   # (S*B, 4H)
    whh_f = whh_ref[0]                                    # (H, 4H)
    whh_b = whh_ref[1]

    def cell(xg_row, h, c, whh):
        gsum = xg_row + jnp.dot(h, whh, preferred_element_type=jnp.float32)
        i_g = jax.nn.sigmoid(gsum[:, 0 * H:1 * H])
        f_g = jax.nn.sigmoid(gsum[:, 1 * H:2 * H])
        g_g = jnp.tanh(gsum[:, 2 * H:3 * H])
        o_g = jax.nn.sigmoid(gsum[:, 3 * H:4 * H])
        c_new = f_g * c + i_g * g_g
        h_new = o_g * jnp.tanh(c_new)
        return h_new, c_new

    h_f = jnp.zeros((B, H), jnp.float32)
    c_f = jnp.zeros((B, H), jnp.float32)
    h_b = jnp.zeros((B, H), jnp.float32)
    c_b = jnp.zeros((B, H), jnp.float32)

    # Statically unrolled time loop (S is small and static); output is written
    # directly in the fused (S, B, 2H) layout the decoder consumes.
    for t in range(S):
        h_f, c_f = cell(xg_f[t * B:(t + 1) * B], h_f, c_f, whh_f)
        enc_ref[t, :, 0:H] = h_f
        tb = S - 1 - t
        h_b, c_b = cell(xg_b[tb * B:(tb + 1) * B], h_b, c_b, whh_b)
        enc_ref[tb, :, H:H2] = h_b

    h0_ref[:, 0:H] = h_f
    h0_ref[:, H:H2] = h_b
    c0_ref[:, 0:H] = c_f
    c0_ref[:, H:H2] = c_b


def bidir_encoder(src_emb2d, S, B, wih, whh, b):
    SB, E = src_emb2d.shape
    H4 = wih.shape[-1]
    H = H4 // 4
    return pl.pallas_call(
        bilstm_encoder_kernel,
        grid=(1,),
        in_specs=[
            pl.BlockSpec((SB, E), lambda i: (0, 0)),
            pl.BlockSpec((2, E, H4), lambda i: (0, 0, 0)),
            pl.BlockSpec((2, H, H4), lambda i: (0, 0, 0)),
            pl.BlockSpec((2, 1, H4), lambda i: (0, 0, 0)),
        ],
        out_specs=(
            pl.BlockSpec((S, B, 2 * H), lambda i: (0, 0, 0)),
            pl.BlockSpec((B, 2 * H), lambda i: (0, 0)),
            pl.BlockSpec((B, 2 * H), lambda i: (0, 0)),
        ),
        out_shape=(
            jax.ShapeDtypeStruct((S, B, 2 * H), jnp.float32),   # encoder states
            jax.ShapeDtypeStruct((B, 2 * H), jnp.float32),      # [h_fwd, h_bwd]
            jax.ShapeDtypeStruct((B, 2 * H), jnp.float32),      # [c_fwd, c_bwd]
        ),
        compiler_params=pltpu.CompilerParams(
            dimension_semantics=("arbitrary",)),
    )(src_emb2d, wih, whh, b)


# ----------------------------------------------------------------------------
# Fused decoder: whole teacher-forcing loop in one kernel, grid over time.
# Grid step 0 = init (bridge states, hoist enc-side attention, outputs[0]=0),
# grid step g>=1 = torch decode step t=g.
# ----------------------------------------------------------------------------
def fused_decoder_kernel(
        tf_ref,                                                    # scalar prefetch (SMEM)
        tok_ref, enc_ref, we_enc_ref, we_h_ref, eb_ref,
        h0_ref, c0_ref, fch_w_ref, fch_b_ref, fcc_w_ref, fcc_b_ref,
        emb_ref, wctx_ref, wemb_ref, whh_ref, b4_ref, fcw_ref, fcb_ref,
        pred_ref, best_ref,                                        # outputs
        h_scr, c_scr, eenc_scr, tok_scr):                          # scratch
    g = pl.program_id(0)
    B, H = h_scr.shape
    S = eenc_scr.shape[1]
    H2 = enc_ref.shape[-1]
    Vtrg = emb_ref.shape[0]
    Vp = fcb_ref.shape[-1]

    # ---- one-time init at grid step 0 ----
    @pl.when(g == 0)
    def _init():
        h_scr[...] = (jnp.dot(h0_ref[...], fch_w_ref[...],
                              preferred_element_type=jnp.float32)
                      + fch_b_ref[...])
        c_scr[...] = (jnp.dot(c0_ref[...], fcc_w_ref[...],
                              preferred_element_type=jnp.float32)
                      + fcc_b_ref[...])
        # loop-invariant enc-side attention term, written column-wise into a
        # (B, S) scratch so no in-kernel transpose is needed.
        for s in range(S):
            eenc_scr[:, s:s + 1] = jnp.sum(enc_ref[s] * we_enc_ref[...],
                                           axis=-1, keepdims=True)
        tok_scr[...] = jnp.zeros((B, 1), jnp.int32)
        pred_ref[...] = jnp.zeros_like(pred_ref)       # torch: outputs[0] stays 0
        best_ref[0] = jnp.zeros((B, 1), jnp.int32)

    # ---- decode step (torch step t = g) ----
    @pl.when(g > 0)
    def _step():
        # input token: teacher forcing (SMEM flag) vs previous in-kernel argmax
        use_tgt = tf_ref[g] == 1
        tokens = jnp.where(use_tgt, tok_ref[g], tok_scr[...])       # (B, 1) int32
        h = h_scr[...]
        c = c_scr[...]

        # embedding lookup as one-hot matmul (no data-dependent gather)
        # TODO(synk): at production vocab sizes replace with a DMA row gather.
        onehot = (jax.lax.broadcasted_iota(jnp.int32, (B, Vtrg), 1)
                  == tokens).astype(jnp.float32)                    # (B, Vtrg)
        emb_x = jnp.dot(onehot, emb_ref[...],
                        preferred_element_type=jnp.float32)         # (B, E)

        # additive attention (lane softmax over source positions, no per-step
        # transpose; context is a small VPU accumulate over S).
        e_h = jnp.sum(h * we_h_ref[...], axis=-1, keepdims=True)    # (B, 1)
        energy = jax.nn.relu(eenc_scr[...] + e_h + eb_ref[0, 0])    # (B, S)
        attn = jax.nn.softmax(energy, axis=-1)                      # (B, S)
        context = jnp.zeros((B, H2), jnp.float32)
        for s in range(S):
            context = context + attn[:, s:s + 1] * enc_ref[s]       # (B, 2H)
        # TODO(synk): at production S*B compute context as a batched dot_general
        # on the MXU with (B, S, 2H)-laid-out encoder states.

        # LSTM cell: fused-gate (In, 4H) bf16 weights, 3 dots/step, f32 acc.
        gsum = (jnp.dot(context.astype(jnp.bfloat16), wctx_ref[...],
                        preferred_element_type=jnp.float32)
                + jnp.dot(emb_x.astype(jnp.bfloat16), wemb_ref[...],
                          preferred_element_type=jnp.float32)
                + jnp.dot(h.astype(jnp.bfloat16), whh_ref[...],
                          preferred_element_type=jnp.float32)
                + b4_ref[...])                                       # (B, 4H)
        i_g = jax.nn.sigmoid(gsum[:, 0 * H:1 * H])
        f_g = jax.nn.sigmoid(gsum[:, 1 * H:2 * H])
        g_g = jnp.tanh(gsum[:, 2 * H:3 * H])
        o_g = jax.nn.sigmoid(gsum[:, 3 * H:4 * H])
        c_new = f_g * c + i_g * g_g
        h_new = o_g * jnp.tanh(c_new)

        # vocab projection: bf16 weights, lane-dense padded V, f32 accumulate
        logits = (jnp.dot(h_new.astype(jnp.bfloat16), fcw_ref[...],
                          preferred_element_type=jnp.float32)
                  + fcb_ref[...])                                    # (B, Vp)
        pred_ref[0] = logits

        # in-kernel argmax (padded columns carry a -1e9 bias so they never win)
        m = jnp.max(logits, axis=-1, keepdims=True)
        vidx = jax.lax.broadcasted_iota(jnp.int32, (B, Vp), 1)
        best = jnp.min(jnp.where(logits == m, vidx, Vp),
                       axis=-1, keepdims=True)                       # (B, 1) int32
        best_ref[g] = best          # resident output block, written back once

        # carry state to the next step
        h_scr[...] = h_new
        c_scr[...] = c_new
        tok_scr[...] = best


def fused_decoder(flags, tok_sched, enc_states, h0, c0, p):
    S, B, H2 = enc_states.shape
    H = H2 // 2
    T = tok_sched.shape[0]
    Vtrg, E = p['dec_embed'].shape
    Vp = p['fc_b_p'].shape[-1]

    grid_spec = pltpu.PrefetchScalarGridSpec(
        num_scalar_prefetch=1,
        grid=(T,),
        in_specs=[
            pl.BlockSpec((T, B, 1), lambda g, tf: (0, 0, 0)),        # token schedule (resident)
            pl.BlockSpec((S, B, H2), lambda g, tf: (0, 0, 0)),       # encoder states (resident)
            pl.BlockSpec((1, H2), lambda g, tf: (0, 0)),             # energy W (enc part)
            pl.BlockSpec((1, H), lambda g, tf: (0, 0)),              # energy W (hidden part)
            pl.BlockSpec(memory_space=pltpu.MemorySpace.SMEM),       # energy bias (scalar)
            pl.BlockSpec((B, H2), lambda g, tf: (0, 0)),             # [h_fwd, h_bwd]
            pl.BlockSpec((B, H2), lambda g, tf: (0, 0)),             # [c_fwd, c_bwd]
            pl.BlockSpec((H2, H), lambda g, tf: (0, 0)),             # fc_hidden W^T
            pl.BlockSpec((1, H), lambda g, tf: (0, 0)),              # fc_hidden b
            pl.BlockSpec((H2, H), lambda g, tf: (0, 0)),             # fc_cell W^T
            pl.BlockSpec((1, H), lambda g, tf: (0, 0)),              # fc_cell b
            pl.BlockSpec((Vtrg, E), lambda g, tf: (0, 0)),           # decoder embedding
            pl.BlockSpec((H2, 4 * H), lambda g, tf: (0, 0)),         # W_in ctx  (bf16, fused gates)
            pl.BlockSpec((E, 4 * H), lambda g, tf: (0, 0)),          # W_in emb  (bf16, fused gates)
            pl.BlockSpec((H, 4 * H), lambda g, tf: (0, 0)),          # W_hh      (bf16, fused gates)
            pl.BlockSpec((1, 4 * H), lambda g, tf: (0, 0)),          # LSTM bias
            pl.BlockSpec((H, Vp), lambda g, tf: (0, 0)),             # fc W^T (bf16, lane padded)
            pl.BlockSpec((1, Vp), lambda g, tf: (0, 0)),             # fc b (padded -1e9)
        ],
        out_specs=(
            pl.BlockSpec((1, B, Vp), lambda g, tf: (g, 0, 0)),       # logits (lane-dense stream)
            pl.BlockSpec((T, B, 1), lambda g, tf: (0, 0, 0)),        # best tokens (resident)
        ),
        scratch_shapes=[
            pltpu.VMEM((B, H), jnp.float32),      # hidden
            pltpu.VMEM((B, H), jnp.float32),      # cell
            pltpu.VMEM((B, S), jnp.float32),      # hoisted enc-side attention term
            pltpu.VMEM((B, 1), jnp.int32),        # previous argmax token
        ],
    )
    return pl.pallas_call(
        fused_decoder_kernel,
        grid_spec=grid_spec,
        out_shape=(
            jax.ShapeDtypeStruct((T, B, Vp), jnp.float32),
            jax.ShapeDtypeStruct((T, B, 1), jnp.int32),
        ),
        compiler_params=pltpu.CompilerParams(
            dimension_semantics=("arbitrary",),
            vmem_limit_bytes=32 * 1024 * 1024),
    )(flags, tok_sched, enc_states, p['we_enc'], p['we_h'], p['energy_b'],
      h0, c0, p['fch_w_t'], p['fch_b'], p['fcc_w_t'], p['fcc_b'],
      p['dec_embed'], p['dec_wctx4'], p['dec_wemb4'], p['dec_whh4'], p['dec_b4'],
      p['fc_w_t'], p['fc_b_p'])


# ----------------------------------------------------------------------------
# Parameter init (torch-style layouts) and one-time kernel-ready re-layout.
# ----------------------------------------------------------------------------
def init_params(key, src_vocab, trg_vocab, E, H):
    ks = jax.random.split(key, 20)
    s = 0.1
    f32 = jnp.float32
    return {
        # encoder
        'enc_embed': jax.random.normal(ks[0], (src_vocab, E), f32) * s,
        'enc_wih_f': jax.random.normal(ks[1], (4 * H, E), f32) * s,
        'enc_whh_f': jax.random.normal(ks[2], (4 * H, H), f32) * s,
        'enc_b_f':   jax.random.normal(ks[3], (1, 4 * H), f32) * s,
        'enc_wih_b': jax.random.normal(ks[4], (4 * H, E), f32) * s,
        'enc_whh_b': jax.random.normal(ks[5], (4 * H, H), f32) * s,
        'enc_b_b':   jax.random.normal(ks[6], (1, 4 * H), f32) * s,
        'fc_hidden_w': jax.random.normal(ks[7], (H, 2 * H), f32) * s,
        'fc_hidden_b': jax.random.normal(ks[8], (1, H), f32) * s,
        'fc_cell_w':   jax.random.normal(ks[9], (H, 2 * H), f32) * s,
        'fc_cell_b':   jax.random.normal(ks[10], (1, H), f32) * s,
        # decoder
        'dec_embed': jax.random.normal(ks[11], (trg_vocab, E), f32) * s,
        'energy_w':  jax.random.normal(ks[12], (1, 3 * H), f32) * s,
        'energy_b':  jax.random.normal(ks[13], (1, 1), f32) * s,
        'dec_wih':   jax.random.normal(ks[14], (4 * H, 2 * H + E), f32) * s,
        'dec_whh':   jax.random.normal(ks[15], (4 * H, H), f32) * s,
        'dec_b':     jax.random.normal(ks[16], (1, 4 * H), f32) * s,
        'fc_w':      jax.random.normal(ks[17], (trg_vocab, H), f32) * s,
        'fc_b':      jax.random.normal(ks[18], (1, trg_vocab), f32) * s,
    }


def prepare_params(p):
    """Re-layout torch-style weights into kernel-friendly fused-gate shapes."""
    H = p['enc_whh_f'].shape[1]
    V = p['fc_w'].shape[0]

    Vp = ((V + 127) // 128) * 128
    fc_w_t = (jnp.zeros((H, Vp), jnp.float32).at[:, :V].set(p['fc_w'].T)
              .astype(jnp.bfloat16))
    fc_b_p = jnp.full((1, Vp), -1e9, jnp.float32).at[:, :V].set(p['fc_b'])

    dec_w_in_t = p['dec_wih'].T                       # (2H+E, 4H) fused gates
    return {
        'enc_embed': p['enc_embed'],
        'enc_wih': jnp.stack([p['enc_wih_f'].T, p['enc_wih_b'].T]),   # (2, E, 4H)
        'enc_whh': jnp.stack([p['enc_whh_f'].T, p['enc_whh_b'].T]),   # (2, H, 4H)
        'enc_b':   jnp.stack([p['enc_b_f'], p['enc_b_b']]),           # (2, 1, 4H)
        'fch_w_t': p['fc_hidden_w'].T,                # (2H, H)
        'fch_b':   p['fc_hidden_b'],                  # (1, H)
        'fcc_w_t': p['fc_cell_w'].T,                  # (2H, H)
        'fcc_b':   p['fc_cell_b'],                    # (1, H)
        'dec_embed': p['dec_embed'],                  # (V, E)
        'we_h':    p['energy_w'][:, :H],              # (1, H)
        'we_enc':  p['energy_w'][:, H:],              # (1, 2H)
        'energy_b': p['energy_b'],                    # (1, 1)  -> SMEM
        'dec_wctx4': dec_w_in_t[:2 * H, :].astype(jnp.bfloat16),   # (2H, 4H)
        'dec_wemb4': dec_w_in_t[2 * H:, :].astype(jnp.bfloat16),   # (E, 4H)
        'dec_whh4':  p['dec_whh'].T.astype(jnp.bfloat16),          # (H, 4H)
        'dec_b4':    p['dec_b'],                                   # (1, 4H)
        'fc_w_t':   fc_w_t,                           # (H, Vp) bf16
        'fc_b_p':   fc_b_p,                           # (1, Vp)
        'trg_vocab': V,
    }


# ----------------------------------------------------------------------------
# Seq2Seq.forward equivalent.
# ----------------------------------------------------------------------------
def seq2seq_forward(p, source, target, teacher_force_ratio=0.5):
    S, B = source.shape
    T = target.shape[0]
    V = p['trg_vocab']
    E = p['enc_embed'].shape[1]

    # --- Encoder (bidirectional 1-layer LSTM), one fused kernel invocation ---
    src_emb2d = p['enc_embed'][source].reshape(S * B, E)     # gather glue
    enc_states, h0, c0 = bidir_encoder(src_emb2d, S, B,
                                       p['enc_wih'], p['enc_whh'], p['enc_b'])

    # --- Teacher-forcing schedule (host-side randomness, like the reference) ---
    # Torch: x = target[1]; for t in 1..T-1: decode(x); x = target[t] if coin_t
    # else argmax.  Grid step g == torch step t; step g uses coin_{g-1}.
    coins = [random.random() < teacher_force_ratio for _ in range(1, T)]
    flags = jnp.array([0, 1] + [int(coins[g - 2]) for g in range(2, T)],
                      dtype=jnp.int32)                                   # (T,)
    tok_sched = jnp.concatenate(
        [jnp.zeros((1, B), jnp.int32), target[1:2], target[1:T - 1]],
        axis=0)[:, :, None].astype(jnp.int32)                            # (T, B, 1)

    # --- Fused decoder loop (attention + LSTM + projection + argmax per step) ---
    preds, best = fused_decoder(flags, tok_sched, enc_states, h0, c0, p)

    outputs = preds[:, :, :V]              # (T, B, V); row 0 is zeros (torch)
    best_guesses = best[1:, :, 0].T        # (B, T-1)
    return outputs, best_guesses


# TODO(synk): decode/greedy_search_decoder/beam_search_decoder (top-k beam
# search) are inference-only helpers outside forward() and are not kernels here.

if __name__ == "__main__":
    random.seed(0)  # deterministic teacher-forcing decisions

    SRC_VOCAB, TRG_VOCAB = 20, 24
    EMB, HID = 16, 32
    SRC_LEN, TRG_LEN, BATCH = 8, 8, 2

    key = jax.random.PRNGKey(0)
    kp, ks, kt = jax.random.split(key, 3)
    raw_params = init_params(kp, SRC_VOCAB, TRG_VOCAB, EMB, HID)
    params = prepare_params(raw_params)

    source = jax.random.randint(ks, (SRC_LEN, BATCH), 0, SRC_VOCAB, dtype=jnp.int32)
    target = jax.random.randint(kt, (TRG_LEN, BATCH), 0, TRG_VOCAB, dtype=jnp.int32)

    outputs, best_guesses = seq2seq_forward(params, source, target,
                                            teacher_force_ratio=0.5)
    jax.block_until_ready(outputs)
    jax.block_until_ready(best_guesses)

    assert outputs.shape == (TRG_LEN, BATCH, TRG_VOCAB)
    assert best_guesses.shape == (BATCH, TRG_LEN - 1)
    assert bool(jnp.all(outputs[0] == 0.0))
    assert bool(jnp.all(best_guesses >= 0)) and bool(jnp.all(best_guesses < TRG_VOCAB))
    assert bool(jnp.all(jnp.isfinite(outputs)))
    print("KERNEL_OK")
</pallas_src>

<mosaic_0001>
module attributes {stable_mosaic.version = 11 : i64} {
  func.func @bilstm_encoder_kernel(%arg0: i32, %arg1: memref<16x16xf32, #tpu.memory_space<vmem>>, %arg2: memref<2x16x128xf32, #tpu.memory_space<vmem>>, %arg3: memref<2x32x128xf32, #tpu.memory_space<vmem>>, %arg4: memref<2x1x128xf32, #tpu.memory_space<vmem>>, %arg5: memref<8x2x64xf32, #tpu.memory_space<vmem>>, %arg6: memref<2x64xf32, #tpu.memory_space<vmem>>, %arg7: memref<2x64xf32, #tpu.memory_space<vmem>>) attributes {dimension_semantics = [#tpu.dimension_semantics<arbitrary>], iteration_bounds = array<i64: 1>, scalar_prefetch = 0 : i64, scratch_operands = 0 : i64, tpu.core_type = #tpu.core_type<tc>, window_params = [{pipeline_mode = #tpu.pipeline_mode<synchronous>, transform_indices = @transform_0, window_bounds = array<i64: 16, 16>}, {pipeline_mode = #tpu.pipeline_mode<synchronous>, transform_indices = @transform_1, window_bounds = array<i64: 2, 16, 128>}, {pipeline_mode = #tpu.pipeline_mode<synchronous>, transform_indices = @transform_2, window_bounds = array<i64: 2, 32, 128>}, {pipeline_mode = #tpu.pipeline_mode<synchronous>, transform_indices = @transform_3, window_bounds = array<i64: 2, 1, 128>}, {pipeline_mode = #tpu.pipeline_mode<synchronous>, transform_indices = @transform_4, window_bounds = array<i64: 8, 2, 64>}, {pipeline_mode = #tpu.pipeline_mode<synchronous>, transform_indices = @transform_5, window_bounds = array<i64: 2, 64>}, {pipeline_mode = #tpu.pipeline_mode<synchronous>, transform_indices = @transform_6, window_bounds = array<i64: 2, 64>}]} {
    %c0 = arith.constant 0 : index
    %c0_0 = arith.constant 0 : index
    %0 = vector.load %arg1[%c0, %c0_0] : memref<16x16xf32, #tpu.memory_space<vmem>>, vector<16x16xf32>
    %c0_1 = arith.constant 0 : index
    %c0_2 = arith.constant 0 : index
    %c0_3 = arith.constant 0 : index
    %1 = vector.load %arg2[%c0_1, %c0_2, %c0_3] : memref<2x16x128xf32, #tpu.memory_space<vmem>>, vector<1x16x128xf32>
    %2 = vector.shape_cast %1 : vector<1x16x128xf32> to vector<16x128xf32>
    %cst = arith.constant dense<0.000000e+00> : vector<16x128xf32>
    %3 = tpu.matmul %0, %2, %cst {dimension_numbers = #tpu.dot_dimension_numbers<[1], [0], [0], [1], [0, 0, 1, 1], [], []>} : vector<16x16xf32>, vector<16x128xf32>, vector<16x128xf32> -> vector<16x128xf32>
    %c0_4 = arith.constant 0 : index
    %c0_5 = arith.constant 0 : index
    %c0_6 = arith.constant 0 : index
    %4 = vector.load %arg4[%c0_4, %c0_5, %c0_6] : memref<2x1x128xf32, #tpu.memory_space<vmem>>, vector<1x1x128xf32>
    %5 = vector.shape_cast %4 : vector<1x1x128xf32> to vector<1x128xf32>
    %6 = vector.broadcast %5 : vector<1x128xf32> to vector<16x128xf32>
    %7 = arith.addf %3, %6 : vector<16x128xf32>
    %c1 = arith.constant 1 : index
    %c0_7 = arith.constant 0 : index
    %c0_8 = arith.constant 0 : index
    %8 = vector.load %arg2[%c1, %c0_7, %c0_8] : memref<2x16x128xf32, #tpu.memory_space<vmem>>, vector<1x16x128xf32>
    %9 = vector.shape_cast %8 : vector<1x16x128xf32> to vector<16x128xf32>
    %cst_9 = arith.constant dense<0.000000e+00> : vector<16x128xf32>
    %10 = tpu.matmul %0, %9, %cst_9 {dimension_numbers = #tpu.dot_dimension_numbers<[1], [0], [0], [1], [0, 0, 1, 1], [], []>} : vector<16x16xf32>, vector<16x128xf32>, vector<16x128xf32> -> vector<16x128xf32>
    %c1_10 = arith.constant 1 : index
    %c0_11 = arith.constant 0 : index
    %c0_12 = arith.constant 0 : index
    %11 = vector.load %arg4[%c1_10, %c0_11, %c0_12] : memref<2x1x128xf32, #tpu.memory_space<vmem>>, vector<1x1x128xf32>
    %12 = vector.shape_cast %11 : vector<1x1x128xf32> to vector<1x128xf32>
    %13 = vector.broadcast %12 : vector<1x128xf32> to vector<16x128xf32>
    %14 = arith.addf %10, %13 : vector<16x128xf32>
    %c0_13 = arith.constant 0 : index
    %c0_14 = arith.constant 0 : index
    %c0_15 = arith.constant 0 : index
    %15 = vector.load %arg3[%c0_13, %c0_14, %c0_15] : memref<2x32x128xf32, #tpu.memory_space<vmem>>, vector<1x32x128xf32>
    %16 = vector.shape_cast %15 : vector<1x32x128xf32> to vector<32x128xf32>
    %c1_16 = arith.constant 1 : index
    %c0_17 = arith.constant 0 : index
    %c0_18 = arith.constant 0 : index
    %17 = vector.load %arg3[%c1_16, %c0_17, %c0_18] : memref<2x32x128xf32, #tpu.memory_space<vmem>>, vector<1x32x128xf32>
    %18 = vector.shape_cast %17 : vector<1x32x128xf32> to vector<32x128xf32>
    %cst_19 = arith.constant 0.000000e+00 : f32
    %19 = vector.broadcast %cst_19 : f32 to vector<2x32xf32>
    %cst_20 = arith.constant 0.000000e+00 : f32
    %20 = vector.broadcast %cst_20 : f32 to vector<2x32xf32>
    %cst_21 = arith.constant 0.000000e+00 : f32
    %21 = vector.broadcast %cst_21 : f32 to vector<2x32xf32>
    %cst_22 = arith.constant 0.000000e+00 : f32
    %22 = vector.broadcast %cst_22 : f32 to vector<2x32xf32>
    %23 = vector.extract_strided_slice %7 {offsets = [0, 0], sizes = [2, 128], strides = [1, 1]} : vector<16x128xf32> to vector<2x128xf32>
    %cst_23 = arith.constant dense<0.000000e+00> : vector<2x128xf32>
    %24 = tpu.matmul %19, %16, %cst_23 {dimension_numbers = #tpu.dot_dimension_numbers<[1], [0], [0], [1], [0, 0, 1, 1], [], []>} : vector<2x32xf32>, vector<32x128xf32>, vector<2x128xf32> -> vector<2x128xf32>
    %25 = arith.addf %23, %24 : vector<2x128xf32>
    %26 = vector.extract_strided_slice %25 {offsets = [0, 0], sizes = [2, 32], strides = [1, 1]} : vector<2x128xf32> to vector<2x32xf32>
    %27 = arith.negf %26 : vector<2x32xf32>
    %28 = math.exp %27 : vector<2x32xf32>
    %cst_24 = arith.constant 1.000000e+00 : f32
    %29 = vector.broadcast %cst_24 : f32 to vector<2x32xf32>
    %30 = arith.addf %29, %28 : vector<2x32xf32>
    %31 = arith.divf %29, %30 : vector<2x32xf32>
    %32 = vector.extract_strided_slice %25 {offsets = [0, 32], sizes = [2, 32], strides = [1, 1]} : vector<2x128xf32> to vector<2x32xf32>
    %33 = arith.negf %32 : vector<2x32xf32>
    %34 = math.exp %33 : vector<2x32xf32>
    %cst_25 = arith.constant 1.000000e+00 : f32
    %35 = vector.broadcast %cst_25 : f32 to vector<2x32xf32>
    %36 = arith.addf %35, %34 : vector<2x32xf32>
    %37 = arith.divf %35, %36 : vector<2x32xf32>
    %38 = vector.extract_strided_slice %25 {offsets = [0, 64], sizes = [2, 32], strides = [1, 1]} : vector<2x128xf32> to vector<2x32xf32>
    %39 = math.tanh %38 : vector<2x32xf32>
    %40 = vector.extract_strided_slice %25 {offsets = [0, 96], sizes = [2, 32], strides = [1, 1]} : vector<2x128xf32> to vector<2x32xf32>
    %41 = arith.negf %40 : vector<2x32xf32>
    %42 = math.exp %41 : vector<2x32xf32>
    %cst_26 = arith.constant 1.000000e+00 : f32
    %43 = vector.broadcast %cst_26 : f32 to vector<2x32xf32>
    %44 = arith.addf %43, %42 : vector<2x32xf32>
    %45 = arith.divf %43, %44 : vector<2x32xf32>
    %46 = arith.mulf %37, %20 : vector<2x32xf32>
    %47 = arith.mulf %31, %39 : vector<2x32xf32>
    %48 = arith.addf %46, %47 : vector<2x32xf32>
    %49 = math.tanh %48 : vector<2x32xf32>
    %50 = arith.mulf %45, %49 : vector<2x32xf32>
    %c0_27 = arith.constant 0 : index
    %c0_28 = arith.constant 0 : index
    %c0_29 = arith.constant 0 : index
    %51 = vector.load %arg5[%c0_27, %c0_28, %c0_29] : memref<8x2x64xf32, #tpu.memory_space<vmem>>, vector<1x2x32xf32>
    %52 = vector.shape_cast %51 : vector<1x2x32xf32> to vector<2x32xf32>
    %53 = vector.shape_cast %50 : vector<2x32xf32> to vector<1x2x32xf32>
    tpu.vector_store %arg5[%c0_27, %c0_28, %c0_29], %53 {strides = array<i32>} : memref<8x2x64xf32, #tpu.memory_space<vmem>>, vector<1x2x32xf32>,
    %54 = vector.extract_strided_slice %14 {offsets = [14, 0], sizes = [2, 128], strides = [1, 1]} : vector<16x128xf32> to vector<2x128xf32>
    %cst_30 = arith.constant dense<0.000000e+00> : vector<2x128xf32>
    %55 = tpu.matmul %21, %18, %cst_30 {dimension_numbers = #tpu.dot_dimension_numbers<[1], [0], [0], [1], [0, 0, 1, 1], [], []>} : vector<2x32xf32>, vector<32x128xf32>, vector<2x128xf32> -> vector<2x128xf32>
    %56 = arith.addf %54, %55 : vector<2x128xf32>
    %57 = vector.extract_strided_slice %56 {offsets = [0, 0], sizes = [2, 32], strides = [1, 1]} : vector<2x128xf32> to vector<2x32xf32>
    %58 = arith.negf %57 : vector<2x32xf32>
    %59 = math.exp %58 : vector<2x32xf32>
    %cst_31 = arith.constant 1.000000e+00 : f32
    %60 = vector.broadcast %cst_31 : f32 to vector<2x32xf32>
    %61 = arith.addf %60, %59 : vector<2x32xf32>
    %62 = arith.divf %60, %61 : vector<2x32xf32>
    %63 = vector.extract_strided_slice %56 {offsets = [0, 32], sizes = [2, 32], strides = [1, 1]} : vector<2x128xf32> to vector<2x32xf32>
    %64 = arith.negf %63 : vector<2x32xf32>
    %65 = math.exp %64 : vector<2x32xf32>
    %cst_32 = arith.constant 1.000000e+00 : f32
    %66 = vector.broadcast %cst_32 : f32 to vector<2x32xf32>
    %67 = arith.addf %66, %65 : vector<2x32xf32>
    %68 = arith.divf %66, %67 : vector<2x32xf32>
    %69 = vector.extract_strided_slice %56 {offsets = [0, 64], sizes = [2, 32], strides = [1, 1]} : vector<2x128xf32> to vector<2x32xf32>
    %70 = math.tanh %69 : vector<2x32xf32>
    %71 = vector.extract_strided_slice %56 {offsets = [0, 96], sizes = [2, 32], strides = [1, 1]} : vector<2x128xf32> to vector<2x32xf32>
    %72 = arith.negf %71 : vector<2x32xf32>
    %73 = math.exp %72 : vector<2x32xf32>
    %cst_33 = arith.constant 1.000000e+00 : f32
    %74 = vector.broadcast %cst_33 : f32 to vector<2x32xf32>
    %75 = arith.addf %74, %73 : vector<2x32xf32>
    %76 = arith.divf %74, %75 : vector<2x32xf32>
    %77 = arith.mulf %68, %22 : vector<2x32xf32>
    %78 = arith.mulf %62, %70 : vector<2x32xf32>
    %79 = arith.addf %77, %78 : vector<2x32xf32>
    %80 = math.tanh %79 : vector<2x32xf32>
    %81 = arith.mulf %76, %80 : vector<2x32xf32>
    %c7 = arith.constant 7 : index
    %c0_34 = arith.constant 0 : index
    %c32 = arith.constant 32 : index
    %82 = vector.load %arg5[%c7, %c0_34, %c32] : memref<8x2x64xf32, #tpu.memory_space<vmem>>, vector<1x2x32xf32>
    %83 = vector.shape_cast %82 : vector<1x2x32xf32> to vector<2x32xf32>
    %84 = vector.shape_cast %81 : vector<2x32xf32> to vector<1x2x32xf32>
    tpu.vector_store %arg5[%c7, %c0_34, %c32], %84 {strides = array<i32>} : memref<8x2x64xf32, #tpu.memory_space<vmem>>, vector<1x2x32xf32>,
    %85 = vector.extract_strided_slice %7 {offsets = [2, 0], sizes = [2, 128], strides = [1, 1]} : vector<16x128xf32> to vector<2x128xf32>
    %cst_35 = arith.constant dense<0.000000e+00> : vector<2x128xf32>
    %86 = tpu.matmul %50, %16, %cst_35 {dimension_numbers = #tpu.dot_dimension_numbers<[1], [0], [0], [1], [0, 0, 1, 1], [], []>} : vector<2x32xf32>, vector<32x128xf32>, vector<2x128xf32> -> vector<2x128xf32>
    %87 = arith.addf %85, %86 : vector<2x128xf32>
    %88 = vector.extract_strided_slice %87 {offsets = [0, 0], sizes = [2, 32], strides = [1, 1]} : vector<2x128xf32> to vector<2x32xf32>
    %89 = arith.negf %88 : vector<2x32xf32>
    %90 = math.exp %89 : vector<2x32xf32>
    %cst_36 = arith.constant 1.000000e+00 : f32
    %91 = vector.broadcast %cst_36 : f32 to vector<2x32xf32>
    %92 = arith.addf %91, %90 : vector<2x32xf32>
    %93 = arith.divf %91, %92 : vector<2x32xf32>
    %94 = vector.extract_strided_slice %87 {offsets = [0, 32], sizes = [2, 32], strides = [1, 1]} : vector<2x128xf32> to vector<2x32xf32>
    %95 = arith.negf %94 : vector<2x32xf32>
    %96 = math.exp %95 : vector<2x32xf32>
    %cst_37 = arith.constant 1.000000e+00 : f32
    %97 = vector.broadcast %cst_37 : f32 to vector<2x32xf32>
    %98 = arith.addf %97, %96 : vector<2x32xf32>
    %99 = arith.divf %97, %98 : vector<2x32xf32>
    %100 = vector.extract_strided_slice %87 {offsets = [0, 64], sizes = [2, 32], strides = [1, 1]} : vector<2x128xf32> to vector<2x32xf32>
    %101 = math.tanh %100 : vector<2x32xf32>
    %102 = vector.extract_strided_slice %87 {offsets = [0, 96], sizes = [2, 32], strides = [1, 1]} : vector<2x128xf32> to vector<2x32xf32>
    %103 = arith.negf %102 : vector<2x32xf32>
    %104 = math.exp %103 : vector<2x32xf32>
    %cst_38 = arith.constant 1.000000e+00 : f32
    %105 = vector.broadcast %cst_38 : f32 to vector<2x32xf32>
    %106 = arith.addf %105, %104 : vector<2x32xf32>
    %107 = arith.divf %105, %106 : vector<2x32xf32>
    %108 = arith.mulf %99, %48 : vector<2x32xf32>
    %109 = arith.mulf %93, %101 : vector<2x32xf32>
    %110 = arith.addf %108, %109 : vector<2x32xf32>
    %111 = math.tanh %110 : vector<2x32xf32>
    %112 = arith.mulf %107, %111 : vector<2x32xf32>
    %c1_39 = arith.constant 1 : index
    %c0_40 = arith.constant 0 : index
    %c0_41 = arith.constant 0 : index
    %113 = vector.load %arg5[%c1_39, %c0_40, %c0_41] : memref<8x2x64xf32, #tpu.memory_space<vmem>>, vector<1x2x32xf32>
    %114 = vector.shape_cast %113 : vector<1x2x32xf32> to vector<2x32xf32>
    %115 = vector.shape_cast %112 : vector<2x32xf32> to vector<1x2x32xf32>
    tpu.vector_store %arg5[%c1_39, %c0_40, %c0_41], %115 {strides = array<i32>} : memref<8x2x64xf32, #tpu.memory_space<vmem>>, vector<1x2x32xf32>,
    %116 = vector.extract_strided_slice %14 {offsets = [12, 0], sizes = [2, 128], strides = [1, 1]} : vector<16x128xf32> to vector<2x128xf32>
    %cst_42 = arith.constant dense<0.000000e+00> : vector<2x128xf32>
    %117 = tpu.matmul %81, %18, %cst_42 {dimension_numbers = #tpu.dot_dimension_numbers<[1], [0], [0], [1], [0, 0, 1, 1], [], []>} : vector<2x32xf32>, vector<32x128xf32>, vector<2x128xf32> -> vector<2x128xf32>
    %118 = arith.addf %116, %117 : vector<2x128xf32>
    %119 = vector.extract_strided_slice %118 {offsets = [0, 0], sizes = [2, 32], strides = [1, 1]} : vector<2x128xf32> to vector<2x32xf32>
    %120 = arith.negf %119 : vector<2x32xf32>
    %121 = math.exp %120 : vector<2x32xf32>
    %cst_43 = arith.constant 1.000000e+00 : f32
    %122 = vector.broadcast %cst_43 : f32 to vector<2x32xf32>
    %123 = arith.addf %122, %121 : vector<2x32xf32>
    %124 = arith.divf %122, %123 : vector<2x32xf32>
    %125 = vector.extract_strided_slice %118 {offsets = [0, 32], sizes = [2, 32], strides = [1, 1]} : vector<2x128xf32> to vector<2x32xf32>
    %126 = arith.negf %125 : vector<2x32xf32>
    %127 = math.exp %126 : vector<2x32xf32>
    %cst_44 = arith.constant 1.000000e+00 : f32
    %128 = vector.broadcast %cst_44 : f32 to vector<2x32xf32>
    %129 = arith.addf %128, %127 : vector<2x32xf32>
    %130 = arith.divf %128, %129 : vector<2x32xf32>
    %131 = vector.extract_strided_slice %118 {offsets = [0, 64], sizes = [2, 32], strides = [1, 1]} : vector<2x128xf32> to vector<2x32xf32>
    %132 = math.tanh %131 : vector<2x32xf32>
    %133 = vector.extract_strided_slice %118 {offsets = [0, 96], sizes = [2, 32], strides = [1, 1]} : vector<2x128xf32> to vector<2x32xf32>
    %134 = arith.negf %133 : vector<2x32xf32>
    %135 = math.exp %134 : vector<2x32xf32>
    %cst_45 = arith.constant 1.000000e+00 : f32
    %136 = vector.broadcast %cst_45 : f32 to vector<2x32xf32>
    %137 = arith.addf %136, %135 : vector<2x32xf32>
    %138 = arith.divf %136, %137 : vector<2x32xf32>
    %139 = arith.mulf %130, %79 : vector<2x32xf32>
    %140 = arith.mulf %124, %132 : vector<2x32xf32>
    %141 = arith.addf %139, %140 : vector<2x32xf32>
    %142 = math.tanh %141 : vector<2x32xf32>
    %143 = arith.mulf %138, %142 : vector<2x32xf32>
    %c6 = arith.constant 6 : index
    %c0_46 = arith.constant 0 : index
    %c32_47 = arith.constant 32 : index
    %144 = vector.load %arg5[%c6, %c0_46, %c32_47] : memref<8x2x64xf32, #tpu.memory_space<vmem>>, vector<1x2x32xf32>
    %145 = vector.shape_cast %144 : vector<1x2x32xf32> to vector<2x32xf32>
    %146 = vector.shape_cast %143 : vector<2x32xf32> to vector<1x2x32xf32>
    tpu.vector_store %arg5[%c6, %c0_46, %c32_47], %146 {strides = array<i32>} : memref<8x2x64xf32, #tpu.memory_space<vmem>>, vector<1x2x32xf32>,
    %147 = vector.extract_strided_slice %7 {offsets = [4, 0], sizes = [2, 128], strides = [1, 1]} : vector<16x128xf32> to vector<2x128xf32>
    %cst_48 = arith.constant dense<0.000000e+00> : vector<2x128xf32>
    %148 = tpu.matmul %112, %16, %cst_48 {dimension_numbers = #tpu.dot_dimension_numbers<[1], [0], [0], [1], [0, 0, 1, 1], [], []>} : vector<2x32xf32>, vector<32x128xf32>, vector<2x128xf32> -> vector<2x128xf32>
    %149 = arith.addf %147, %148 : vector<2x128xf32>
    %150 = vector.extract_strided_slice %149 {offsets = [0, 0], sizes = [2, 32], strides = [1, 1]} : vector<2x128xf32> to vector<2x32xf32>
    %151 = arith.negf %150 : vector<2x32xf32>
    %152 = math.exp %151 : vector<2x32xf32>
    %cst_49 = arith.constant 1.000000e+00 : f32
    %153 = vector.broadcast %cst_49 : f32 to vector<2x32xf32>
    %154 = arith.addf %153, %152 : vector<2x32xf32>
    %155 = arith.divf %153, %154 : vector<2x32xf32>
    %156 = vector.extract_strided_slice %149 {offsets = [0, 32], sizes = [2, 32], strides = [1, 1]} : vector<2x128xf32> to vector<2x32xf32>
    %157 = arith.negf %156 : vector<2x32xf32>
    %158 = math.exp %157 : vector<2x32xf32>
    %cst_50 = arith.constant 1.000000e+00 : f32
    %159 = vector.broadcast %cst_50 : f32 to vector<2x32xf32>
    %160 = arith.addf %159, %158 : vector<2x32xf32>
    %161 = arith.divf %159, %160 : vector<2x32xf32>
    %162 = vector.extract_strided_slice %149 {offsets = [0, 64], sizes = [2, 32], strides = [1, 1]} : vector<2x128xf32> to vector<2x32xf32>
    %163 = math.tanh %162 : vector<2x32xf32>
    %164 = vector.extract_strided_slice %149 {offsets = [0, 96], sizes = [2, 32], strides = [1, 1]} : vector<2x128xf32> to vector<2x32xf32>
    %165 = arith.negf %164 : vector<2x32xf32>
    %166 = math.exp %165 : vector<2x32xf32>
    %cst_51 = arith.constant 1.000000e+00 : f32
    %167 = vector.broadcast %cst_51 : f32 to vector<2x32xf32>
    %168 = arith.addf %167, %166 : vector<2x32xf32>
    %169 = arith.divf %167, %168 : vector<2x32xf32>
    %170 = arith.mulf %161, %110 : vector<2x32xf32>
    %171 = arith.mulf %155, %163 : vector<2x32xf32>
    %172 = arith.addf %170, %171 : vector<2x32xf32>
    %173 = math.tanh %172 : vector<2x32xf32>
    %174 = arith.mulf %169, %173 : vector<2x32xf32>
    %c2 = arith.constant 2 : index
    %c0_52 = arith.constant 0 : index
    %c0_53 = arith.constant 0 : index
    %175 = vector.load %arg5[%c2, %c0_52, %c0_53] : memref<8x2x64xf32, #tpu.memory_space<vmem>>, vector<1x2x32xf32>
    %176 = vector.shape_cast %175 : vector<1x2x32xf32> to vector<2x32xf32>
    %177 = vector.shape_cast %174 : vector<2x32xf32> to vector<1x2x32xf32>
    tpu.vector_store %arg5[%c2, %c0_52, %c0_53], %177 {strides = array<i32>} : memref<8x2x64xf32, #tpu.memory_space<vmem>>, vector<1x2x32xf32>,
    %178 = vector.extract_strided_slice %14 {offsets = [10, 0], sizes = [2, 128], strides = [1, 1]} : vector<16x128xf32> to vector<2x128xf32>
    %cst_54 = arith.constant dense<0.000000e+00> : vector<2x128xf32>
    %179 = tpu.matmul %143, %18, %cst_54 {dimension_numbers = #tpu.dot_dimension_numbers<[1], [0], [0], [1], [0, 0, 1, 1], [], []>} : vector<2x32xf32>, vector<32x128xf32>, vector<2x128xf32> -> vector<2x128xf32>
    %180 = arith.addf %178, %179 : vector<2x128xf32>
    %181 = vector.extract_strided_slice %180 {offsets = [0, 0], sizes = [2, 32], strides = [1, 1]} : vector<2x128xf32> to vector<2x32xf32>
    %182 = arith.negf %181 : vector<2x32xf32>
    %183 = math.exp %182 : vector<2x32xf32>
    %cst_55 = arith.constant 1.000000e+00 : f32
    %184 = vector.broadcast %cst_55 : f32 to vector<2x32xf32>
    %185 = arith.addf %184, %183 : vector<2x32xf32>
    %186 = arith.divf %184, %185 : vector<2x32xf32>
    %187 = vector.extract_strided_slice %180 {offsets = [0, 32], sizes = [2, 32], strides = [1, 1]} : vector<2x128xf32> to vector<2x32xf32>
    %188 = arith.negf %187 : vector<2x32xf32>
    %189 = math.exp %188 : vector<2x32xf32>
    %cst_56 = arith.constant 1.000000e+00 : f32
    %190 = vector.broadcast %cst_56 : f32 to vector<2x32xf32>
    %191 = arith.addf %190, %189 : vector<2x32xf32>
    %192 = arith.divf %190, %191 : vector<2x32xf32>
    %193 = vector.extract_strided_slice %180 {offsets = [0, 64], sizes = [2, 32], strides = [1, 1]} : vector<2x128xf32> to vector<2x32xf32>
    %194 = math.tanh %193 : vector<2x32xf32>
    %195 = vector.extract_strided_slice %180 {offsets = [0, 96], sizes = [2, 32], strides = [1, 1]} : vector<2x128xf32> to vector<2x32xf32>
    %196 = arith.negf %195 : vector<2x32xf32>
    %197 = math.exp %196 : vector<2x32xf32>
    %cst_57 = arith.constant 1.000000e+00 : f32
    %198 = vector.broadcast %cst_57 : f32 to vector<2x32xf32>
    %199 = arith.addf %198, %197 : vector<2x32xf32>
    %200 = arith.divf %198, %199 : vector<2x32xf32>
    %201 = arith.mulf %192, %141 : vector<2x32xf32>
    %202 = arith.mulf %186, %194 : vector<2x32xf32>
    %203 = arith.addf %201, %202 : vector<2x32xf32>
    %204 = math.tanh %203 : vector<2x32xf32>
    %205 = arith.mulf %200, %204 : vector<2x32xf32>
    %c5 = arith.constant 5 : index
    %c0_58 = arith.constant 0 : index
    %c32_59 = arith.constant 32 : index
    %206 = vector.load %arg5[%c5, %c0_58, %c32_59] : memref<8x2x64xf32, #tpu.memory_space<vmem>>, vector<1x2x32xf32>
    %207 = vector.shape_cast %206 : vector<1x2x32xf32> to vector<2x32xf32>
    %208 = vector.shape_cast %205 : vector<2x32xf32> to vector<1x2x32xf32>
    tpu.vector_store %arg5[%c5, %c0_58, %c32_59], %208 {strides = array<i32>} : memref<8x2x64xf32, #tpu.memory_space<vmem>>, vector<1x2x32xf32>,
    %209 = vector.extract_strided_slice %7 {offsets = [6, 0], sizes = [2, 128], strides = [1, 1]} : vector<16x128xf32> to vector<2x128xf32>
    %cst_60 = arith.constant dense<0.000000e+00> : vector<2x128xf32>
    %210 = tpu.matmul %174, %16, %cst_60 {dimension_numbers = #tpu.dot_dimension_numbers<[1], [0], [0], [1], [0, 0, 1, 1], [], []>} : vector<2x32xf32>, vector<32x128xf32>, vector<2x128xf32> -> vector<2x128xf32>
    %211 = arith.addf %209, %210 : vector<2x128xf32>
    %212 = vector.extract_strided_slice %211 {offsets = [0, 0], sizes = [2, 32], strides = [1, 1]} : vector<2x128xf32> to vector<2x32xf32>
    %213 = arith.negf %212 : vector<2x32xf32>
    %214 = math.exp %213 : vector<2x32xf32>
    %cst_61 = arith.constant 1.000000e+00 : f32
    %215 = vector.broadcast %cst_61 : f32 to vector<2x32xf32>
    %216 = arith.addf %215, %214 : vector<2x32xf32>
    %217 = arith.divf %215, %216 : vector<2x32xf32>
    %218 = vector.extract_strided_slice %211 {offsets = [0, 32], sizes = [2, 32], strides = [1, 1]} : vector<2x128xf32> to vector<2x32xf32>
    %219 = arith.negf %218 : vector<2x32xf32>
    %220 = math.exp %219 : vector<2x32xf32>
    %cst_62 = arith.constant 1.000000e+00 : f32
    %221 = vector.broadcast %cst_62 : f32 to vector<2x32xf32>
    %222 = arith.addf %221, %220 : vector<2x32xf32>
    %223 = arith.divf %221, %222 : vector<2x32xf32>
    %224 = vector.extract_strided_slice %211 {offsets = [0, 64], sizes = [2, 32], strides = [1, 1]} : vector<2x128xf32> to vector<2x32xf32>
    %225 = math.tanh %224 : vector<2x32xf32>
    %226 = vector.extract_strided_slice %211 {offsets = [0, 96], sizes = [2, 32], strides = [1, 1]} : vector<2x128xf32> to vector<2x32xf32>
    %227 = arith.negf %226 : vector<2x32xf32>
    %228 = math.exp %227 : vector<2x32xf32>
    %cst_63 = arith.constant 1.000000e+00 : f32
    %229 = vector.broadcast %cst_63 : f32 to vector<2x32xf32>
    %230 = arith.addf %229, %228 : vector<2x32xf32>
    %231 = arith.divf %229, %230 : vector<2x32xf32>
    %232 = arith.mulf %223, %172 : vector<2x32xf32>
    %233 = arith.mulf %217, %225 : vector<2x32xf32>
    %234 = arith.addf %232, %233 : vector<2x32xf32>
    %235 = math.tanh %234 : vector<2x32xf32>
    %236 = arith.mulf %231, %235 : vector<2x32xf32>
    %c3 = arith.constant 3 : index
    %c0_64 = arith.constant 0 : index
    %c0_65 = arith.constant 0 : index
    %237 = vector.load %arg5[%c3, %c0_64, %c0_65] : memref<8x2x64xf32, #tpu.memory_space<vmem>>, vector<1x2x32xf32>
    %238 = vector.shape_cast %237 : vector<1x2x32xf32> to vector<2x32xf32>
    %239 = vector.shape_cast %236 : vector<2x32xf32> to vector<1x2x32xf32>
    tpu.vector_store %arg5[%c3, %c0_64, %c0_65], %239 {strides = array<i32>} : memref<8x2x64xf32, #tpu.memory_space<vmem>>, vector<1x2x32xf32>,
    %240 = vector.extract_strided_slice %14 {offsets = [8, 0], sizes = [2, 128], strides = [1, 1]} : vector<16x128xf32> to vector<2x128xf32>
    %cst_66 = arith.constant dense<0.000000e+00> : vector<2x128xf32>
    %241 = tpu.matmul %205, %18, %cst_66 {dimension_numbers = #tpu.dot_dimension_numbers<[1], [0], [0], [1], [0, 0, 1, 1], [], []>} : vector<2x32xf32>, vector<32x128xf32>, vector<2x128xf32> -> vector<2x128xf32>
    %242 = arith.addf %240, %241 : vector<2x128xf32>
    %243 = vector.extract_strided_slice %242 {offsets = [0, 0], sizes = [2, 32], strides = [1, 1]} : vector<2x128xf32> to vector<2x32xf32>
    %244 = arith.negf %243 : vector<2x32xf32>
    %245 = math.exp %244 : vector<2x32xf32>
    %cst_67 = arith.constant 1.000000e+00 : f32
    %246 = vector.broadcast %cst_67 : f32 to vector<2x32xf32>
    %247 = arith.addf %246, %245 : vector<2x32xf32>
    %248 = arith.divf %246, %247 : vector<2x32xf32>
    %249 = vector.extract_strided_slice %242 {offsets = [0, 32], sizes = [2, 32], strides = [1, 1]} : vector<2x128xf32> to vector<2x32xf32>
    %250 = arith.negf %249 : vector<2x32xf32>
    %251 = math.exp %250 : vector<2x32xf32>
    %cst_68 = arith.constant 1.000000e+00 : f32
    %252 = vector.broadcast %cst_68 : f32 to vector<2x32xf32>
    %253 = arith.addf %252, %251 : vector<2x32xf32>
    %254 = arith.divf %252, %253 : vector<2x32xf32>
    %255 = vector.extract_strided_slice %242 {offsets = [0, 64], sizes = [2, 32], strides = [1, 1]} : vector<2x128xf32> to vector<2x32xf32>
    %256 = math.tanh %255 : vector<2x32xf32>
    %257 = vector.extract_strided_slice %242 {offsets = [0, 96], sizes = [2, 32], strides = [1, 1]} : vector<2x128xf32> to vector<2x32xf32>
    %258 = arith.negf %257 : vector<2x32xf32>
    %259 = math.exp %258 : vector<2x32xf32>
    %cst_69 = arith.constant 1.000000e+00 : f32
    %260 = vector.broadcast %cst_69 : f32 to vector<2x32xf32>
    %261 = arith.addf %260, %259 : vector<2x32xf32>
    %262 = arith.divf %260, %261 : vector<2x32xf32>
    %263 = arith.mulf %254, %203 : vector<2x32xf32>
    %264 = arith.mulf %248, %256 : vector<2x32xf32>
    %265 = arith.addf %263, %264 : vector<2x32xf32>
    %266 = math.tanh %265 : vector<2x32xf32>
    %267 = arith.mulf %262, %266 : vector<2x32xf32>
    %c4 = arith.constant 4 : index
    %c0_70 = arith.constant 0 : index
    %c32_71 = arith.constant 32 : index
    %268 = vector.load %arg5[%c4, %c0_70, %c32_71] : memref<8x2x64xf32, #tpu.memory_space<vmem>>, vector<1x2x32xf32>
    %269 = vector.shape_cast %268 : vector<1x2x32xf32> to vector<2x32xf32>
    %270 = vector.shape_cast %267 : vector<2x32xf32> to vector<1x2x32xf32>
    tpu.vector_store %arg5[%c4, %c0_70, %c32_71], %270 {strides = array<i32>} : memref<8x2x64xf32, #tpu.memory_space<vmem>>, vector<1x2x32xf32>,
    %271 = vector.extract_strided_slice %7 {offsets = [8, 0], sizes = [2, 128], strides = [1, 1]} : vector<16x128xf32> to vector<2x128xf32>
    %cst_72 = arith.constant dense<0.000000e+00> : vector<2x128xf32>
    %272 = tpu.matmul %236, %16, %cst_72 {dimension_numbers = #tpu.dot_dimension_numbers<[1], [0], [0], [1], [0, 0, 1, 1], [], []>} : vector<2x32xf32>, vector<32x128xf32>, vector<2x128xf32> -> vector<2x128xf32>
    %273 = arith.addf %271, %272 : vector<2x128xf32>
    %274 = vector.extract_strided_slice %273 {offsets = [0, 0], sizes = [2, 32], strides = [1, 1]} : vector<2x128xf32> to vector<2x32xf32>
    %275 = arith.negf %274 : vector<2x32xf32>
    %276 = math.exp %275 : vector<2x32xf32>
    %cst_73 = arith.constant 1.000000e+00 : f32
    %277 = vector.broadcast %cst_73 : f32 to vector<2x32xf32>
    %278 = arith.addf %277, %276 : vector<2x32xf32>
    %279 = arith.divf %277, %278 : vector<2x32xf32>
    %280 = vector.extract_strided_slice %273 {offsets = [0, 32], sizes = [2, 32], strides = [1, 1]} : vector<2x128xf32> to vector<2x32xf32>
    %281 = arith.negf %280 : vector<2x32xf32>
    %282 = math.exp %281 : vector<2x32xf32>
    %cst_74 = arith.constant 1.000000e+00 : f32
    %283 = vector.broadcast %cst_74 : f32 to vector<2x32xf32>
    %284 = arith.addf %283, %282 : vector<2x32xf32>
    %285 = arith.divf %283, %284 : vector<2x32xf32>
    %286 = vector.extract_strided_slice %273 {offsets = [0, 64], sizes = [2, 32], strides = [1, 1]} : vector<2x128xf32> to vector<2x32xf32>
    %287 = math.tanh %286 : vector<2x32xf32>
    %288 = vector.extract_strided_slice %273 {offsets = [0, 96], sizes = [2, 32], strides = [1, 1]} : vector<2x128xf32> to vector<2x32xf32>
    %289 = arith.negf %288 : vector<2x32xf32>
    %290 = math.exp %289 : vector<2x32xf32>
    %cst_75 = arith.constant 1.000000e+00 : f32
    %291 = vector.broadcast %cst_75 : f32 to vector<2x32xf32>
    %292 = arith.addf %291, %290 : vector<2x32xf32>
    %293 = arith.divf %291, %292 : vector<2x32xf32>
    %294 = arith.mulf %285, %234 : vector<2x32xf32>
    %295 = arith.mulf %279, %287 : vector<2x32xf32>
    %296 = arith.addf %294, %295 : vector<2x32xf32>
    %297 = math.tanh %296 : vector<2x32xf32>
    %298 = arith.mulf %293, %297 : vector<2x32xf32>
    %c4_76 = arith.constant 4 : index
    %c0_77 = arith.constant 0 : index
    %c0_78 = arith.constant 0 : index
    %299 = vector.load %arg5[%c4_76, %c0_77, %c0_78] : memref<8x2x64xf32, #tpu.memory_space<vmem>>, vector<1x2x32xf32>
    %300 = vector.shape_cast %299 : vector<1x2x32xf32> to vector<2x32xf32>
    %301 = vector.shape_cast %298 : vector<2x32xf32> to vector<1x2x32xf32>
    tpu.vector_store %arg5[%c4_76, %c0_77, %c0_78], %301 {strides = array<i32>} : memref<8x2x64xf32, #tpu.memory_space<vmem>>, vector<1x2x32xf32>,
    %302 = vector.extract_strided_slice %14 {offsets = [6, 0], sizes = [2, 128], strides = [1, 1]} : vector<16x128xf32> to vector<2x128xf32>
    %cst_79 = arith.constant dense<0.000000e+00> : vector<2x128xf32>
    %303 = tpu.matmul %267, %18, %cst_79 {dimension_numbers = #tpu.dot_dimension_numbers<[1], [0], [0], [1], [0, 0, 1, 1], [], []>} : vector<2x32xf32>, vector<32x128xf32>, vector<2x128xf32> -> vector<2x128xf32>
    %304 = arith.addf %302, %303 : vector<2x128xf32>
    %305 = vector.extract_strided_slice %304 {offsets = [0, 0], sizes = [2, 32], strides = [1, 1]} : vector<2x128xf32> to vector<2x32xf32>
    %306 = arith.negf %305 : vector<2x32xf32>
    %307 = math.exp %306 : vector<2x32xf32>
    %cst_80 = arith.constant 1.000000e+00 : f32
    %308 = vector.broadcast %cst_80 : f32 to vector<2x32xf32>
    %309 = arith.addf %308, %307 : vector<2x32xf32>
    %310 = arith.divf %308, %309 : vector<2x32xf32>
    %311 = vector.extract_strided_slice %304 {offsets = [0, 32], sizes = [2, 32], strides = [1, 1]} : vector<2x128xf32> to vector<2x32xf32>
    %312 = arith.negf %311 : vector<2x32xf32>
    %313 = math.exp %312 : vector<2x32xf32>
    %cst_81 = arith.constant 1.000000e+00 : f32
    %314 = vector.broadcast %cst_81 : f32 to vector<2x32xf32>
    %315 = arith.addf %314, %313 : vector<2x32xf32>
    %316 = arith.divf %314, %315 : vector<2x32xf32>
    %317 = vector.extract_strided_slice %304 {offsets = [0, 64], sizes = [2, 32], strides = [1, 1]} : vector<2x128xf32> to vector<2x32xf32>
    %318 = math.tanh %317 : vector<2x32xf32>
    %319 = vector.extract_strided_slice %304 {offsets = [0, 96], sizes = [2, 32], strides = [1, 1]} : vector<2x128xf32> to vector<2x32xf32>
    %320 = arith.negf %319 : vector<2x32xf32>
    %321 = math.exp %320 : vector<2x32xf32>
    %cst_82 = arith.constant 1.000000e+00 : f32
    %322 = vector.broadcast %cst_82 : f32 to vector<2x32xf32>
    %323 = arith.addf %322, %321 : vector<2x32xf32>
    %324 = arith.divf %322, %323 : vector<2x32xf32>
    %325 = arith.mulf %316, %265 : vector<2x32xf32>
    %326 = arith.mulf %310, %318 : vector<2x32xf32>
    %327 = arith.addf %325, %326 : vector<2x32xf32>
    %328 = math.tanh %327 : vector<2x32xf32>
    %329 = arith.mulf %324, %328 : vector<2x32xf32>
    %c3_83 = arith.constant 3 : index
    %c0_84 = arith.constant 0 : index
    %c32_85 = arith.constant 32 : index
    %330 = vector.load %arg5[%c3_83, %c0_84, %c32_85] : memref<8x2x64xf32, #tpu.memory_space<vmem>>, vector<1x2x32xf32>
    %331 = vector.shape_cast %330 : vector<1x2x32xf32> to vector<2x32xf32>
    %332 = vector.shape_cast %329 : vector<2x32xf32> to vector<1x2x32xf32>
    tpu.vector_store %arg5[%c3_83, %c0_84, %c32_85], %332 {strides = array<i32>} : memref<8x2x64xf32, #tpu.memory_space<vmem>>, vector<1x2x32xf32>,
    %333 = vector.extract_strided_slice %7 {offsets = [10, 0], sizes = [2, 128], strides = [1, 1]} : vector<16x128xf32> to vector<2x128xf32>
    %cst_86 = arith.constant dense<0.000000e+00> : vector<2x128xf32>
    %334 = tpu.matmul %298, %16, %cst_86 {dimension_numbers = #tpu.dot_dimension_numbers<[1], [0], [0], [1], [0, 0, 1, 1], [], []>} : vector<2x32xf32>, vector<32x128xf32>, vector<2x128xf32> -> vector<2x128xf32>
    %335 = arith.addf %333, %334 : vector<2x128xf32>
    %336 = vector.extract_strided_slice %335 {offsets = [0, 0], sizes = [2, 32], strides = [1, 1]} : vector<2x128xf32> to vector<2x32xf32>
    %337 = arith.negf %336 : vector<2x32xf32>
    %338 = math.exp %337 : vector<2x32xf32>
    %cst_87 = arith.constant 1.000000e+00 : f32
    %339 = vector.broadcast %cst_87 : f32 to vector<2x32xf32>
    %340 = arith.addf %339, %338 : vector<2x32xf32>
    %341 = arith.divf %339, %340 : vector<2x32xf32>
    %342 = vector.extract_strided_slice %335 {offsets = [0, 32], sizes = [2, 32], strides = [1, 1]} : vector<2x128xf32> to vector<2x32xf32>
    %343 = arith.negf %342 : vector<2x32xf32>
    %344 = math.exp %343 : vector<2x32xf32>
    %cst_88 = arith.constant 1.000000e+00 : f32
    %345 = vector.broadcast %cst_88 : f32 to vector<2x32xf32>
    %346 = arith.addf %345, %344 : vector<2x32xf32>
    %347 = arith.divf %345, %346 : vector<2x32xf32>
    %348 = vector.extract_strided_slice %335 {offsets = [0, 64], sizes = [2, 32], strides = [1, 1]} : vector<2x128xf32> to vector<2x32xf32>
    %349 = math.tanh %348 : vector<2x32xf32>
    %350 = vector.extract_strided_slice %335 {offsets = [0, 96], sizes = [2, 32], strides = [1, 1]} : vector<2x128xf32> to vector<2x32xf32>
    %351 = arith.negf %350 : vector<2x32xf32>
    %352 = math.exp %351 : vector<2x32xf32>
    %cst_89 = arith.constant 1.000000e+00 : f32
    %353 = vector.broadcast %cst_89 : f32 to vector<2x32xf32>
    %354 = arith.addf %353, %352 : vector<2x32xf32>
    %355 = arith.divf %353, %354 : vector<2x32xf32>
    %356 = arith.mulf %347, %296 : vector<2x32xf32>
    %357 = arith.mulf %341, %349 : vector<2x32xf32>
    %358 = arith.addf %356, %357 : vector<2x32xf32>
    %359 = math.tanh %358 : vector<2x32xf32>
    %360 = arith.mulf %355, %359 : vector<2x32xf32>
    %c5_90 = arith.constant 5 : index
    %c0_91 = arith.constant 0 : index
    %c0_92 = arith.constant 0 : index
    %361 = vector.load %arg5[%c5_90, %c0_91, %c0_92] : memref<8x2x64xf32, #tpu.memory_space<vmem>>, vector<1x2x32xf32>
    %362 = vector.shape_cast %361 : vector<1x2x32xf32> to vector<2x32xf32>
    %363 = vector.shape_cast %360 : vector<2x32xf32> to vector<1x2x32xf32>
    tpu.vector_store %arg5[%c5_90, %c0_91, %c0_92], %363 {strides = array<i32>} : memref<8x2x64xf32, #tpu.memory_space<vmem>>, vector<1x2x32xf32>,
    %364 = vector.extract_strided_slice %14 {offsets = [4, 0], sizes = [2, 128], strides = [1, 1]} : vector<16x128xf32> to vector<2x128xf32>
    %cst_93 = arith.constant dense<0.000000e+00> : vector<2x128xf32>
    %365 = tpu.matmul %329, %18, %cst_93 {dimension_numbers = #tpu.dot_dimension_numbers<[1], [0], [0], [1], [0, 0, 1, 1], [], []>} : vector<2x32xf32>, vector<32x128xf32>, vector<2x128xf32> -> vector<2x128xf32>
    %366 = arith.addf %364, %365 : vector<2x128xf32>
    %367 = vector.extract_strided_slice %366 {offsets = [0, 0], sizes = [2, 32], strides = [1, 1]} : vector<2x128xf32> to vector<2x32xf32>
    %368 = arith.negf %367 : vector<2x32xf32>
    %369 = math.exp %368 : vector<2x32xf32>
    %cst_94 = arith.constant 1.000000e+00 : f32
    %370 = vector.broadcast %cst_94 : f32 to vector<2x32xf32>
    %371 = arith.addf %370, %369 : vector<2x32xf32>
    %372 = arith.divf %370, %371 : vector<2x32xf32>
    %373 = vector.extract_strided_slice %366 {offsets = [0, 32], sizes = [2, 32], strides = [1, 1]} : vector<2x128xf32> to vector<2x32xf32>
    %374 = arith.negf %373 : vector<2x32xf32>
    %375 = math.exp %374 : vector<2x32xf32>
    %cst_95 = arith.constant 1.000000e+00 : f32
    %376 = vector.broadcast %cst_95 : f32 to vector<2x32xf32>
    %377 = arith.addf %376, %375 : vector<2x32xf32>
    %378 = arith.divf %376, %377 : vector<2x32xf32>
    %379 = vector.extract_strided_slice %366 {offsets = [0, 64], sizes = [2, 32], strides = [1, 1]} : vector<2x128xf32> to vector<2x32xf32>
    %380 = math.tanh %379 : vector<2x32xf32>
    %381 = vector.extract_strided_slice %366 {offsets = [0, 96], sizes = [2, 32], strides = [1, 1]} : vector<2x128xf32> to vector<2x32xf32>
    %382 = arith.negf %381 : vector<2x32xf32>
    %383 = math.exp %382 : vector<2x32xf32>
    %cst_96 = arith.constant 1.000000e+00 : f32
    %384 = vector.broadcast %cst_96 : f32 to vector<2x32xf32>
    %385 = arith.addf %384, %383 : vector<2x32xf32>
    %386 = arith.divf %384, %385 : vector<2x32xf32>
    %387 = arith.mulf %378, %327 : vector<2x32xf32>
    %388 = arith.mulf %372, %380 : vector<2x32xf32>
    %389 = arith.addf %387, %388 : vector<2x32xf32>
    %390 = math.tanh %389 : vector<2x32xf32>
    %391 = arith.mulf %386, %390 : vector<2x32xf32>
    %c2_97 = arith.constant 2 : index
    %c0_98 = arith.constant 0 : index
    %c32_99 = arith.constant 32 : index
    %392 = vector.load %arg5[%c2_97, %c0_98, %c32_99] : memref<8x2x64xf32, #tpu.memory_space<vmem>>, vector<1x2x32xf32>
    %393 = vector.shape_cast %392 : vector<1x2x32xf32> to vector<2x32xf32>
    %394 = vector.shape_cast %391 : vector<2x32xf32> to vector<1x2x32xf32>
    tpu.vector_store %arg5[%c2_97, %c0_98, %c32_99], %394 {strides = array<i32>} : memref<8x2x64xf32, #tpu.memory_space<vmem>>, vector<1x2x32xf32>,
    %395 = vector.extract_strided_slice %7 {offsets = [12, 0], sizes = [2, 128], strides = [1, 1]} : vector<16x128xf32> to vector<2x128xf32>
    %cst_100 = arith.constant dense<0.000000e+00> : vector<2x128xf32>
    %396 = tpu.matmul %360, %16, %cst_100 {dimension_numbers = #tpu.dot_dimension_numbers<[1], [0], [0], [1], [0, 0, 1, 1], [], []>} : vector<2x32xf32>, vector<32x128xf32>, vector<2x128xf32> -> vector<2x128xf32>
    %397 = arith.addf %395, %396 : vector<2x128xf32>
    %398 = vector.extract_strided_slice %397 {offsets = [0, 0], sizes = [2, 32], strides = [1, 1]} : vector<2x128xf32> to vector<2x32xf32>
    %399 = arith.negf %398 : vector<2x32xf32>
    %400 = math.exp %399 : vector<2x32xf32>
    %cst_101 = arith.constant 1.000000e+00 : f32
    %401 = vector.broadcast %cst_101 : f32 to vector<2x32xf32>
    %402 = arith.addf %401, %400 : vector<2x32xf32>
    %403 = arith.divf %401, %402 : vector<2x32xf32>
    %404 = vector.extract_strided_slice %397 {offsets = [0, 32], sizes = [2, 32], strides = [1, 1]} : vector<2x128xf32> to vector<2x32xf32>
    %405 = arith.negf %404 : vector<2x32xf32>
    %406 = math.exp %405 : vector<2x32xf32>
    %cst_102 = arith.constant 1.000000e+00 : f32
    %407 = vector.broadcast %cst_102 : f32 to vector<2x32xf32>
    %408 = arith.addf %407, %406 : vector<2x32xf32>
    %409 = arith.divf %407, %408 : vector<2x32xf32>
    %410 = vector.extract_strided_slice %397 {offsets = [0, 64], sizes = [2, 32], strides = [1, 1]} : vector<2x128xf32> to vector<2x32xf32>
    %411 = math.tanh %410 : vector<2x32xf32>
    %412 = vector.extract_strided_slice %397 {offsets = [0, 96], sizes = [2, 32], strides = [1, 1]} : vector<2x128xf32> to vector<2x32xf32>
    %413 = arith.negf %412 : vector<2x32xf32>
    %414 = math.exp %413 : vector<2x32xf32>
    %cst_103 = arith.constant 1.000000e+00 : f32
    %415 = vector.broadcast %cst_103 : f32 to vector<2x32xf32>
    %416 = arith.addf %415, %414 : vector<2x32xf32>
    %417 = arith.divf %415, %416 : vector<2x32xf32>
    %418 = arith.mulf %409, %358 : vector<2x32xf32>
    %419 = arith.mulf %403, %411 : vector<2x32xf32>
    %420 = arith.addf %418, %419 : vector<2x32xf32>
    %421 = math.tanh %420 : vector<2x32xf32>
    %422 = arith.mulf %417, %421 : vector<2x32xf32>
    %c6_104 = arith.constant 6 : index
    %c0_105 = arith.constant 0 : index
    %c0_106 = arith.constant 0 : index
    %423 = vector.load %arg5[%c6_104, %c0_105, %c0_106] : memref<8x2x64xf32, #tpu.memory_space<vmem>>, vector<1x2x32xf32>
    %424 = vector.shape_cast %423 : vector<1x2x32xf32> to vector<2x32xf32>
    %425 = vector.shape_cast %422 : vector<2x32xf32> to vector<1x2x32xf32>
    tpu.vector_store %arg5[%c6_104, %c0_105, %c0_106], %425 {strides = array<i32>} : memref<8x2x64xf32, #tpu.memory_space<vmem>>, vector<1x2x32xf32>,
    %426 = vector.extract_strided_slice %14 {offsets = [2, 0], sizes = [2, 128], strides = [1, 1]} : vector<16x128xf32> to vector<2x128xf32>
    %cst_107 = arith.constant dense<0.000000e+00> : vector<2x128xf32>
    %427 = tpu.matmul %391, %18, %cst_107 {dimension_numbers = #tpu.dot_dimension_numbers<[1], [0], [0], [1], [0, 0, 1, 1], [], []>} : vector<2x32xf32>, vector<32x128xf32>, vector<2x128xf32> -> vector<2x128xf32>
    %428 = arith.addf %426, %427 : vector<2x128xf32>
    %429 = vector.extract_strided_slice %428 {offsets = [0, 0], sizes = [2, 32], strides = [1, 1]} : vector<2x128xf32> to vector<2x32xf32>
    %430 = arith.negf %429 : vector<2x32xf32>
    %431 = math.exp %430 : vector<2x32xf32>
    %cst_108 = arith.constant 1.000000e+00 : f32
    %432 = vector.broadcast %cst_108 : f32 to vector<2x32xf32>
    %433 = arith.addf %432, %431 : vector<2x32xf32>
    %434 = arith.divf %432, %433 : vector<2x32xf32>
    %435 = vector.extract_strided_slice %428 {offsets = [0, 32], sizes = [2, 32], strides = [1, 1]} : vector<2x128xf32> to vector<2x32xf32>
    %436 = arith.negf %435 : vector<2x32xf32>
    %437 = math.exp %436 : vector<2x32xf32>
    %cst_109 = arith.constant 1.000000e+00 : f32
    %438 = vector.broadcast %cst_109 : f32 to vector<2x32xf32>
    %439 = arith.addf %438, %437 : vector<2x32xf32>
    %440 = arith.divf %438, %439 : vector<2x32xf32>
    %441 = vector.extract_strided_slice %428 {offsets = [0, 64], sizes = [2, 32], strides = [1, 1]} : vector<2x128xf32> to vector<2x32xf32>
    %442 = math.tanh %441 : vector<2x32xf32>
    %443 = vector.extract_strided_slice %428 {offsets = [0, 96], sizes = [2, 32], strides = [1, 1]} : vector<2x128xf32> to vector<2x32xf32>
    %444 = arith.negf %443 : vector<2x32xf32>
    %445 = math.exp %444 : vector<2x32xf32>
    %cst_110 = arith.constant 1.000000e+00 : f32
    %446 = vector.broadcast %cst_110 : f32 to vector<2x32xf32>
    %447 = arith.addf %446, %445 : vector<2x32xf32>
    %448 = arith.divf %446, %447 : vector<2x32xf32>
    %449 = arith.mulf %440, %389 : vector<2x32xf32>
    %450 = arith.mulf %434, %442 : vector<2x32xf32>
    %451 = arith.addf %449, %450 : vector<2x32xf32>
    %452 = math.tanh %451 : vector<2x32xf32>
    %453 = arith.mulf %448, %452 : vector<2x32xf32>
    %c1_111 = arith.constant 1 : index
    %c0_112 = arith.constant 0 : index
    %c32_113 = arith.constant 32 : index
    %454 = vector.load %arg5[%c1_111, %c0_112, %c32_113] : memref<8x2x64xf32, #tpu.memory_space<vmem>>, vector<1x2x32xf32>
    %455 = vector.shape_cast %454 : vector<1x2x32xf32> to vector<2x32xf32>
    %456 = vector.shape_cast %453 : vector<2x32xf32> to vector<1x2x32xf32>
    tpu.vector_store %arg5[%c1_111, %c0_112, %c32_113], %456 {strides = array<i32>} : memref<8x2x64xf32, #tpu.memory_space<vmem>>, vector<1x2x32xf32>,
    %457 = vector.extract_strided_slice %7 {offsets = [14, 0], sizes = [2, 128], strides = [1, 1]} : vector<16x128xf32> to vector<2x128xf32>
    %cst_114 = arith.constant dense<0.000000e+00> : vector<2x128xf32>
    %458 = tpu.matmul %422, %16, %cst_114 {dimension_numbers = #tpu.dot_dimension_numbers<[1], [0], [0], [1], [0, 0, 1, 1], [], []>} : vector<2x32xf32>, vector<32x128xf32>, vector<2x128xf32> -> vector<2x128xf32>
    %459 = arith.addf %457, %458 : vector<2x128xf32>
    %460 = vector.extract_strided_slice %459 {offsets = [0, 0], sizes = [2, 32], strides = [1, 1]} : vector<2x128xf32> to vector<2x32xf32>
    %461 = arith.negf %460 : vector<2x32xf32>
    %462 = math.exp %461 : vector<2x32xf32>
    %cst_115 = arith.constant 1.000000e+00 : f32
    %463 = vector.broadcast %cst_115 : f32 to vector<2x32xf32>
    %464 = arith.addf %463, %462 : vector<2x32xf32>
    %465 = arith.divf %463, %464 : vector<2x32xf32>
    %466 = vector.extract_strided_slice %459 {offsets = [0, 32], sizes = [2, 32], strides = [1, 1]} : vector<2x128xf32> to vector<2x32xf32>
    %467 = arith.negf %466 : vector<2x32xf32>
    %468 = math.exp %467 : vector<2x32xf32>
    %cst_116 = arith.constant 1.000000e+00 : f32
    %469 = vector.broadcast %cst_116 : f32 to vector<2x32xf32>
    %470 = arith.addf %469, %468 : vector<2x32xf32>
    %471 = arith.divf %469, %470 : vector<2x32xf32>
    %472 = vector.extract_strided_slice %459 {offsets = [0, 64], sizes = [2, 32], strides = [1, 1]} : vector<2x128xf32> to vector<2x32xf32>
    %473 = math.tanh %472 : vector<2x32xf32>
    %474 = vector.extract_strided_slice %459 {offsets = [0, 96], sizes = [2, 32], strides = [1, 1]} : vector<2x128xf32> to vector<2x32xf32>
    %475 = arith.negf %474 : vector<2x32xf32>
    %476 = math.exp %475 : vector<2x32xf32>
    %cst_117 = arith.constant 1.000000e+00 : f32
    %477 = vector.broadcast %cst_117 : f32 to vector<2x32xf32>
    %478 = arith.addf %477, %476 : vector<2x32xf32>
    %479 = arith.divf %477, %478 : vector<2x32xf32>
    %480 = arith.mulf %471, %420 : vector<2x32xf32>
    %481 = arith.mulf %465, %473 : vector<2x32xf32>
    %482 = arith.addf %480, %481 : vector<2x32xf32>
    %483 = math.tanh %482 : vector<2x32xf32>
    %484 = arith.mulf %479, %483 : vector<2x32xf32>
    %c7_118 = arith.constant 7 : index
    %c0_119 = arith.constant 0 : index
    %c0_120 = arith.constant 0 : index
    %485 = vector.load %arg5[%c7_118, %c0_119, %c0_120] : memref<8x2x64xf32, #tpu.memory_space<vmem>>, vector<1x2x32xf32>
    %486 = vector.shape_cast %485 : vector<1x2x32xf32> to vector<2x32xf32>
    %487 = vector.shape_cast %484 : vector<2x32xf32> to vector<1x2x32xf32>
    tpu.vector_store %arg5[%c7_118, %c0_119, %c0_120], %487 {strides = array<i32>} : memref<8x2x64xf32, #tpu.memory_space<vmem>>, vector<1x2x32xf32>,
    %488 = vector.extract_strided_slice %14 {offsets = [0, 0], sizes = [2, 128], strides = [1, 1]} : vector<16x128xf32> to vector<2x128xf32>
    %cst_121 = arith.constant dense<0.000000e+00> : vector<2x128xf32>
    %489 = tpu.matmul %453, %18, %cst_121 {dimension_numbers = #tpu.dot_dimension_numbers<[1], [0], [0], [1], [0, 0, 1, 1], [], []>} : vector<2x32xf32>, vector<32x128xf32>, vector<2x128xf32> -> vector<2x128xf32>
    %490 = arith.addf %488, %489 : vector<2x128xf32>
    %491 = vector.extract_strided_slice %490 {offsets = [0, 0], sizes = [2, 32], strides = [1, 1]} : vector<2x128xf32> to vector<2x32xf32>
    %492 = arith.negf %491 : vector<2x32xf32>
    %493 = math.exp %492 : vector<2x32xf32>
    %cst_122 = arith.constant 1.000000e+00 : f32
    %494 = vector.broadcast %cst_122 : f32 to vector<2x32xf32>
    %495 = arith.addf %494, %493 : vector<2x32xf32>
    %496 = arith.divf %494, %495 : vector<2x32xf32>
    %497 = vector.extract_strided_slice %490 {offsets = [0, 32], sizes = [2, 32], strides = [1, 1]} : vector<2x128xf32> to vector<2x32xf32>
    %498 = arith.negf %497 : vector<2x32xf32>
    %499 = math.exp %498 : vector<2x32xf32>
    %cst_123 = arith.constant 1.000000e+00 : f32
    %500 = vector.broadcast %cst_123 : f32 to vector<2x32xf32>
    %501 = arith.addf %500, %499 : vector<2x32xf32>
    %502 = arith.divf %500, %501 : vector<2x32xf32>
    %503 = vector.extract_strided_slice %490 {offsets = [0, 64], sizes = [2, 32], strides = [1, 1]} : vector<2x128xf32> to vector<2x32xf32>
    %504 = math.tanh %503 : vector<2x32xf32>
    %505 = vector.extract_strided_slice %490 {offsets = [0, 96], sizes = [2, 32], strides = [1, 1]} : vector<2x128xf32> to vector<2x32xf32>
    %506 = arith.negf %505 : vector<2x32xf32>
    %507 = math.exp %506 : vector<2x32xf32>
    %cst_124 = arith.constant 1.000000e+00 : f32
    %508 = vector.broadcast %cst_124 : f32 to vector<2x32xf32>
    %509 = arith.addf %508, %507 : vector<2x32xf32>
    %510 = arith.divf %508, %509 : vector<2x32xf32>
    %511 = arith.mulf %502, %451 : vector<2x32xf32>
    %512 = arith.mulf %496, %504 : vector<2x32xf32>
    %513 = arith.addf %511, %512 : vector<2x32xf32>
    %514 = math.tanh %513 : vector<2x32xf32>
    %515 = arith.mulf %510, %514 : vector<2x32xf32>
    %c0_125 = arith.constant 0 : index
    %c0_126 = arith.constant 0 : index
    %c32_127 = arith.constant 32 : index
    %516 = vector.load %arg5[%c0_125, %c0_126, %c32_127] : memref<8x2x64xf32, #tpu.memory_space<vmem>>, vector<1x2x32xf32>
    %517 = vector.shape_cast %516 : vector<1x2x32xf32> to vector<2x32xf32>
    %518 = vector.shape_cast %515 : vector<2x32xf32> to vector<1x2x32xf32>
    tpu.vector_store %arg5[%c0_125, %c0_126, %c32_127], %518 {strides = array<i32>} : memref<8x2x64xf32, #tpu.memory_space<vmem>>, vector<1x2x32xf32>,
    %c0_128 = arith.constant 0 : index
    %c0_129 = arith.constant 0 : index
    %519 = vector.load %arg6[%c0_128, %c0_129] : memref<2x64xf32, #tpu.memory_space<vmem>>, vector<2x32xf32>
    tpu.vector_store %arg6[%c0_128, %c0_129], %484 {strides = array<i32>} : memref<2x64xf32, #tpu.memory_space<vmem>>, vector<2x32xf32>,
    %c0_130 = arith.constant 0 : index
    %c32_131 = arith.constant 32 : index
    %520 = vector.load %arg6[%c0_130, %c32_131] : memref<2x64xf32, #tpu.memory_space<vmem>>, vector<2x32xf32>
    tpu.vector_store %arg6[%c0_130, %c32_131], %515 {strides = array<i32>} : memref<2x64xf32, #tpu.memory_space<vmem>>, vector<2x32xf32>,
    %c0_132 = arith.constant 0 : index
    %c0_133 = arith.constant 0 : index
    %521 = vector.load %arg7[%c0_132, %c0_133] : memref<2x64xf32, #tpu.memory_space<vmem>>, vector<2x32xf32>
    tpu.vector_store %arg7[%c0_132, %c0_133], %482 {strides = array<i32>} : memref<2x64xf32, #tpu.memory_space<vmem>>, vector<2x32xf32>,
    %c0_134 = arith.constant 0 : index
    %c32_135 = arith.constant 32 : index
    %522 = vector.load %arg7[%c0_134, %c32_135] : memref<2x64xf32, #tpu.memory_space<vmem>>, vector<2x32xf32>
    tpu.vector_store %arg7[%c0_134, %c32_135], %513 {strides = array<i32>} : memref<2x64xf32, #tpu.memory_space<vmem>>, vector<2x32xf32>,
    return
  }
  func.func @transform_0(%arg0: i32) -> (i32, i32) {
    %c0_i32 = arith.constant 0 : i32
    %c0_i32_0 = arith.constant 0 : i32
    %c0_i32_1 = arith.constant 0 : i32
    return %c0_i32, %c0_i32_0 : i32, i32
  }
  func.func @transform_1(%arg0: i32) -> (i32, i32, i32) {
    %c0_i32 = arith.constant 0 : i32
    %c0_i32_0 = arith.constant 0 : i32
    %c0_i32_1 = arith.constant 0 : i32
    %c0_i32_2 = arith.constant 0 : i32
    return %c0_i32, %c0_i32_0, %c0_i32_1 : i32, i32, i32
  }
  func.func @transform_2(%arg0: i32) -> (i32, i32, i32) {
    %c0_i32 = arith.constant 0 : i32
    %c0_i32_0 = arith.constant 0 : i32
    %c0_i32_1 = arith.constant 0 : i32
    %c0_i32_2 = arith.constant 0 : i32
    return %c0_i32, %c0_i32_0, %c0_i32_1 : i32, i32, i32
  }
  func.func @transform_3(%arg0: i32) -> (i32, i32, i32) {
    %c0_i32 = arith.constant 0 : i32
    %c0_i32_0 = arith.constant 0 : i32
    %c0_i32_1 = arith.constant 0 : i32
    %c0_i32_2 = arith.constant 0 : i32
    return %c0_i32, %c0_i32_0, %c0_i32_1 : i32, i32, i32
  }
  func.func @transform_4(%arg0: i32) -> (i32, i32, i32) {
    %c0_i32 = arith.constant 0 : i32
    %c0_i32_0 = arith.constant 0 : i32
    %c0_i32_1 = arith.constant 0 : i32
    %c0_i32_2 = arith.constant 0 : i32
    return %c0_i32, %c0_i32_0, %c0_i32_1 : i32, i32, i32
  }
  func.func @transform_5(%arg0: i32) -> (i32, i32) {
    %c0_i32 = arith.constant 0 : i32
    %c0_i32_0 = arith.constant 0 : i32
    %c0_i32_1 = arith.constant 0 : i32
    return %c0_i32, %c0_i32_0 : i32, i32
  }
  func.func @transform_6(%arg0: i32) -> (i32, i32) {
    %c0_i32 = arith.constant 0 : i32
    %c0_i32_0 = arith.constant 0 : i32
    %c0_i32_1 = arith.constant 0 : i32
    return %c0_i32, %c0_i32_0 : i32, i32
  }
}

</mosaic_0001>

<bundles_post_ra>
// kernel: tpu_custom_call.1
= control target key start
LH: loop header
LB: loop body
LE: loop exit
PB: predicated region body
PF: predicated region fallthrough
CT: control target
= control target key end

     0   :  { %12 = vsyncpa [#allocation3], 0  ;;  %s3270_s0 = inlined_call_operand.hbm [shape: f32[16,16], index: 0, kind: input, shape index: {}]   ;;  %s3271_s1 = inlined_call_operand.hbm [shape: f32[2,16,128], index: 1, kind: input, shape index: {}]   ;;  %s3272_s2 = inlined_call_operand.hbm [shape: f32[2,32,128], index: 2, kind: input, shape index: {}]   ;;  %s3273_s3 = inlined_call_operand.vmem [shape: f32[2,1,128], index: 3, kind: input, shape index: {}]   ;;  %s3274_s4 = inlined_call_operand.hbm [shape: f32[8,2,64], index: 4, kind: output, shape index: {0}]   ;;  %s3275_s5 = inlined_call_operand.hbm [shape: f32[2,64], index: 5, kind: output, shape index: {1}]   ;;  %s3276_s6 = inlined_call_operand.hbm [shape: f32[2,64], index: 6, kind: output, shape index: {2}]  }
   0x1   :  { %13 = vsyncpa [#allocation6], 0 }
   0x2   :  { %14 = vsyncpa [#allocation4], 0 }
   0x3   :  { %15 = vsyncpa [#allocation10], 0  ;;  %s2766_s21 = smov [#allocation5]   ;;  %s2767_s23 = smov [#allocation2]  }
   0x4   :  { %s33_s22 = sshll.u32 %s2766_s21, 4  ;;  %s21_s24 = sshll.u32 %s2767_s23, 4  ;;  %s34_s22 = int_to_ptr.vmem [resolvable:$true] %s33_s22  ;;  %s2816_s24 = int_to_ptr.vmem [resolvable:$true] %s21_s24 }
   0x5   :  { %s2626_s27 = scalar_lea.hbm %s3271_s1, 512 }
   0x6   :  { %p2627_p0 = scmp.ne.s32.totalorder %s3271_s1, %s2626_s27  ;;  %p2630_p1 = scmp.lt.u32.totalorder %s2626_s27, %s3271_s1 }
   0x8   :  { %p2632_p2 = pnand %p2630_p1, %p2627_p0 }
   0xa   :  { %2635 = shalt.err (!%p2632_p2)
}
   0xb   :  { %s2636_s8 = scalar_lea.vmem %s34_s22, 512  ;;  %p2641_p4 = scmp.lt.s32.totalorder %s34_s22, %s34_s22 }
   0xc   :  { %p2637_p3 = scmp.ne.s32.totalorder %s34_s22, %s2636_s8  ;;  %p2642_p5 = scmp.lt.s32.totalorder %s2636_s8, %s2636_s8 }
   0xe   :  { %p2643_p6 = por %p2642_p5, %p2641_p4 }
  0x10   :  { %p2644_p7 = pnand %p2643_p6, %p2637_p3 }
  0x12   :  { %2647 = shalt.err (!%p2644_p7)
}
  0x13   :  { %s2768_s9 = smov 128   ;;  %s2769_s10 = smov 8  }
  0x14   :  { %39 = dma.hbm_to_vmem [thread:$0]  %s3271_s1, 512, %s34_s22, [#allocation6], %s2768_s9, %s2768_s9, %s2769_s10  }
  0x15   :  { %s2648_s15 = scalar_lea.hbm %s3270_s0, 256 }
  0x16   :  { %p2649_p8 = scmp.ne.s32.totalorder %s3270_s0, %s2648_s15  ;;  %p2652_p9 = scmp.lt.u32.totalorder %s2648_s15, %s3270_s0 }
  0x18   :  { %p2654_p10 = pnand %p2652_p9, %p2649_p8 }
  0x1a   :  { %2657 = shalt.err (!%p2654_p10)
}
  0x1b   :  { %s2658_s20 = scalar_lea.vmem %s2816_s24, 256  ;;  %p2663_p12 = scmp.lt.s32.totalorder %s2816_s24, %s2816_s24 }
  0x1c   :  { %p2659_p11 = scmp.ne.s32.totalorder %s2816_s24, %s2658_s20  ;;  %p2664_p13 = scmp.lt.s32.totalorder %s2658_s20, %s2658_s20 }
  0x1e   :  { %p2665_p0 = por %p2664_p13, %p2663_p12 }
  0x20   :  { %p2666_p1 = pnand %p2665_p0, %p2659_p11 }
  0x22   :  { %2669 = shalt.err (!%p2666_p1)
}
  0x23   :  { %27 = dma.hbm_to_vmem [thread:$0]  %s3270_s0, 256, %s2816_s24, [#allocation3], %s2768_s9, %s2768_s9, %s2769_s10  }
  0x24   :  { %s2770_s22 = smov [#allocation7]   ;;  %s2670_s27 = scalar_lea.hbm %s3272_s2, 1024 }
  0x25   :  { %s45_s23 = sshll.u32 %s2770_s22, 4  ;;  %p2671_p2 = scmp.ne.s32.totalorder %s3272_s2, %s2670_s27  ;;  %s46_s23 = int_to_ptr.vmem [resolvable:$true] %s45_s23 }
  0x26   :  { %p2674_p3 = scmp.lt.u32.totalorder %s2670_s27, %s3272_s2 }
  0x28   :  { %p2676_p4 = pnand %p2674_p3, %p2671_p2 }
  0x2a   :  { %2679 = shalt.err (!%p2676_p4)
}
  0x2b   :  { %s2680_s8 = scalar_lea.vmem %s46_s23, 1024  ;;  %p2685_p6 = scmp.lt.s32.totalorder %s46_s23, %s46_s23 }
  0x2c   :  { %p2681_p5 = scmp.ne.s32.totalorder %s46_s23, %s2680_s8  ;;  %p2686_p7 = scmp.lt.s32.totalorder %s2680_s8, %s2680_s8 }
  0x2e   :  { %p2687_p8 = por %p2686_p7, %p2685_p6 }
  0x30   :  { %p2688_p9 = pnand %p2687_p8, %p2681_p5 }
  0x32   :  { %2691 = shalt.err (!%p2688_p9)
}
  0x33   :  { %51 = dma.hbm_to_vmem [thread:$0]  %s3272_s2, 1024, %s46_s23, [#allocation6], %s2768_s9, %s2768_s9, %s2769_s10  }
  0x34   :  { %2758 = dma.done.wait [#allocation3], 256  }
  0x35   :  { %2759 = vsyncadd [#allocation3], 4294967040 }
  0x36   :  { %2760 = dma.done.wait [#allocation6], 1536  }
  0x37   :  { %2761 = vsyncadd [#allocation6], 4294965760  ;;  %vm74_vm0 = vcmask 130048   ;;  %v65_v0 = vld [vmem:[#allocation5] sm:$0xff]  ;;  %v66_v1 = vld [vmem:[#allocation5 + $0x8] sm:$0xff]  ;;  %v2771_v13 = vmov 0.0|0.0  }
  0x38   :  { %v157_v2 = vld [vmem:[#allocation5 + $0x10] sm:$0xff]  ;;  %v2379_v3 = vpack.c.bf16 %v66_v1, %v65_v0  ;;  %v158_v4 = vld [vmem:[#allocation5 + $0x18] sm:$0xff]  ;;  %v242_v7 = vld [vmem:[#allocation7] sm:$0xff]  ;;  %vm2772_vm1 = vmmov 0   ;;  %v2773_v21 = vmov 0.0   ;;  %s2775_s12 = smov 32  }
  0x39   :  { %v63_v5 = vld [vmem:[#allocation2] sm:$0xff]  ;;  %v2383_v6 = vpack.c.bf16 %v158_v4, %v157_v2  ;;  %v243_v8 = vld [vmem:[#allocation7 + $0x8] sm:$0xff]  ;;  %v247_v9 = vld [vmem:[#allocation7 + $0x20] sm:$0xff]  ;;  %vm354_vm2 = vcmask 254976   ;;  %vm251_vm3 = vcmask 261120   ;;  %s2776_s13 = smov 96  }
  0x3a   :  { %2193 = vmatprep.mubr.msk.f32.mxu0 %vm74_vm0, %v63_v5  ;;  %2200 = vmatprep.mubr.msk.f32.mxu1 %vm74_vm0, %v63_v5  ;;  %v248_v10 = vld [vmem:[#allocation7 + $0x28] sm:$0xff]  ;;  %v64_v11 = vld [vmem:[#allocation2 + $0x8] sm:$0xff]  ;;  %v2870_v12 = vpack.c.bf16 %v243_v8, %v242_v7  ;;  %v244_v15 = vld [vmem:[#allocation7 + $0x10] sm:$0xff]  ;;  %vm569_vm4 = vcmask 257026   ;;  %vm459_vm5 = vcmask 523526   ;;  %vm795_vm6 = vcmask 259076  }
  0x3b   :  { %2380 = vmatprep.subr.bf16.mxu0 %v2379_v3  ;;  %2384 = vmatprep.subr.bf16.mxu1 %v2383_v6  ;;  %v2873_v14 = vpack.c.bf16 %v248_v10, %v247_v9  ;;  %v245_v16 = vld [vmem:[#allocation7 + $0x18] sm:$0xff]  ;;  %v249_v17 = vld [vmem:[#allocation7 + $0x30] sm:$0xff]  ;;  %vm682_vm7 = vcmask 521476   ;;  %vm1021_vm8 = vcmask 261126   ;;  %vm908_vm9 = vcmask 519426   ;;  %s2777_s14 = smov [#allocation9]  }
  0x3c   :  { %2382 = vmatpush3.bf16.msra.mxu0 %v2379_v3  ;;  %2386 = vmatpush3.bf16.msra.mxu1 %v2383_v6  ;;  %v250_v18 = vld [vmem:[#allocation7 + $0x38] sm:$0xff]  ;;  %v2879_v19 = vpack.c.bf16 %v245_v16, %v244_v15  ;;  %v2064_v22 = vld [vmem:[%s3273_s3] ss:$0 sm:$0xff]  ;;  %v2068_v24 = vld [vmem:[%s3273_s3 + $0x1] ss:$0 sm:$0xff]  ;;  %s2774_s3 = smov 64  }
  0x3d   :  { %2387 = vmatprep.subr.bf16.mxu0 %v2771_v13  ;;  %2393 = vmatprep.subr.bf16.mxu1 %v2771_v13  ;;  %v2883_v20 = vpack.c.bf16 %v250_v18, %v249_v17  ;;  %vm1131_vm10 = vcmask 517376   ;;  %s2037_s15 = sshll.u32 %s2777_s14, 4  ;;  %s2778_s16 = smov [#allocation11]   ;;  %s2038_s15 = int_to_ptr.vmem [resolvable:$true] %s2037_s15 }
  0x3e   :  { %s2047_s17 = sshll.u32 %s2778_s16, 4  ;;  %s2779_s18 = smov [#allocation8]   ;;  %s3215_s17 = int_to_ptr.vmem [resolvable:$true] %s2047_s17 }
  0x3f   :  { %2194 = vmatmul.mubr.msk.f32.vlgmr.msra.gmra.mrb[0].mxu0 %vm74_vm0, %v64_v11  ;;  %2201 = vmatmul.mubr.msk.f32.vlgmr.msra.gmra.mrb[0].mxu1 %vm74_vm0, %v64_v11  ;;  %s2024_s19 = sshll.u32 %s2779_s18, 4  ;;  %s2692_s20 = scalar_lea.vmem %s2038_s15, 32  ;;  %s3219_s19 = int_to_ptr.vmem [resolvable:$true] %s2024_s19 }
  0x40   :  { %2389 = vmatpush3.bf16.msra.mxu0 %v2870_v12  ;;  %2395 = vmatpush3.bf16.msra.mxu1 %v2873_v14  ;;  %p2693_p10 = scmp.ne.s32.totalorder %s2038_s15, %s2692_s20  ;;  %p2697_p11 = scmp.lt.s32.totalorder %s2038_s15, %s2038_s15 }
  0x41   :  { %2390 = vmatprep.subr.bf16.mxu0 %v2771_v13  ;;  %2396 = vmatprep.subr.bf16.mxu1 %v2771_v13  ;;  %p2698_p12 = scmp.lt.s32.totalorder %s2692_s20, %s2692_s20 }
  0x42   :  { %2211 = vmatprep.mubr.msk.f32.mxu0 %vm2772_vm1, %v2773_v21  ;;  %2222 = vmatprep.mubr.msk.f32.mxu1 %vm2772_vm1, %v2773_v21 }
  0x43   :  { %p2699_p13 = por %p2698_p12, %p2697_p11 }
  0x44   :  { %2392 = vmatpush3.bf16.msra.mxu0 %v2879_v19  ;;  %2398 = vmatpush3.bf16.msra.mxu1 %v2883_v20 }
  0x45   :  { %2399 = vmatprep.subr.bf16.mxu0 %v2771_v13  ;;  %2405 = vmatprep.subr.bf16.mxu1 %v2771_v13  ;;  %p2700_p0 = pnand %p2699_p13, %p2693_p10 }
  0x47   :  { %2212 = vmatmul.mubr.f32.vlgmr.msra.gmra.mrb[2].mxu0 %v2773_v21  ;;  %2223 = vmatmul.mubr.f32.vlgmr.msra.gmra.mrb[2].mxu1 %v2773_v21 }
  0x48   :  { %2401 = vmatpush3.bf16.msra.mxu0 %v2870_v12  ;;  %2233 = vmatprep.mubr.msk.f32.mxu0 %vm2772_vm1, %v2773_v21 }
  0x49   :  { %2402 = vmatprep.subr.bf16.mxu0 %v2771_v13  ;;  %2407 = vmatpush3.bf16.msra.mxu1 %v2873_v14 }
  0x4a   :  { %2244 = vmatprep.mubr.msk.f32.mxu1 %vm2772_vm1, %v2773_v21  ;;  %2408 = vmatprep.subr.bf16.mxu1 %v2771_v13 }
  0x4c   :  { %2404 = vmatpush3.bf16.msra.mxu0 %v2879_v19 }
  0x4d   :  { %2411 = vmatprep.subr.bf16.mxu0 %v2771_v13  ;;  %2410 = vmatpush3.bf16.msra.mxu1 %v2883_v20 }
  0x4e   :  { %2417 = vmatprep.subr.bf16.mxu1 %v2771_v13 }
 0x112   :  { %v2195_v23 = vpop.f32.mrb[0].mxu0  ;;  %v2202_v27 = vpop.f32.mrb[0].mxu1 }
 0x113   :  { %v2914_v25 = vadd.f32 %v2195_v23, %v2064_v22  ;;  %v147_v26 = vpop.f32.mrb[1].mxu0  ;;  %v233_v28 = vpop.f32.mrb[1].mxu1  ;;  %v2921_v35 = vadd.f32 %v2202_v27, %v2068_v24 }
 0x114   :  { %v2916_v29 = vadd.f32 %v2068_v24, %v233_v28  ;;  %v2918_v30 = vadd.f32 %v2064_v22, %v147_v26 }
 0x11a   :  { %v321_v31 = vpop.f32.mrb[2].mxu0  ;;  %v422_v33 = vpop.f32.mrb[2].mxu1 }
 0x11b   :  { %v325_v32 = vadd.f32 %v321_v31, %v2918_v30  ;;  %v2213_v34 = vpop.f32.mrb[3].mxu0  ;;  %v427_v36 = vrot.slane %v422_v33, 2  ;;  %v2224_v37 = vpop.f32.mrb[3].mxu1 }
 0x11d   :  { %2498 = vtanh.f32 %v325_v32  ;;  %v429_v38 = vadd.f32 %v427_v36, %v2921_v35  ;;  %v2071_v41 = vmul.f32 -1.442695, %v325_v32 }
 0x11f   :  { %2500 = vtanh.f32 %v429_v38  ;;  %v2072_v42 = vmul.f32 -1.442695, %v429_v38 }
 0x120   :  { %2502 = vpow2.f32 %v2071_v41 }
 0x121   :  { %2504 = vpow2.f32 %v2072_v42 }
 0x127   :  { %v2499_v39 = vpop.eup %2498 }
 0x128   :  { %335 = vrot.lane.b32.xlu0 %v2499_v39, %s2774_s3 }
 0x129   :  { %v2501_v40 = vpop.eup %2500 }
 0x12a   :  { %v2503_v43 = vpop.eup %2502 }
 0x12b   :  { %v329_v44 = vadd.f32 1.0, %v2503_v43  ;;  %v2505_v45 = vpop.eup %2504 }
 0x12c   :  { %439 = vrot.lane.b32.xlu0 %v2501_v40, %s2774_s3  ;;  %v433_v46 = vadd.f32 1.0, %v2505_v45 }
 0x12d   :  { %2506 = vrcp.f32 %v329_v44 }
 0x12e   :  { %2508 = vrcp.f32 %v433_v46 }
 0x137   :  { %v2507_v47 = vpop.eup %2506 }
 0x138   :  { %v2509_v50 = vpop.eup %2508  ;;  %v333_v53 = vmul.f32 0.0, %v2507_v47 }
 0x139   :  { %v437_v56 = vmul.f32 0.0, %v2509_v50 }
 0x19a   :  { %v336_v48 = vpop.permute.xlu0 %335 }
 0x19b   :  { %v338_v49 = vmul.f32 %v2507_v47, %v336_v48 }
 0x19d   :  { %340 = vrot.lane.b32.xlu1 %v338_v49, %s2775_s12 }
 0x19e   :  { %v440_v51 = vpop.permute.xlu0 %439 }
 0x19f   :  { %v442_v52 = vmul.f32 %v2509_v50, %v440_v51 }
 0x1a1   :  { %444 = vrot.lane.b32.xlu1 %v442_v52, %s2775_s12 }
 0x20f   :  { %v341_v54 = vpop.permute.xlu1 %340 }
 0x210   :  { %v2928_v55 = vadd.f32 %v341_v54, %v333_v53 }
 0x212   :  { %2510 = vtanh.f32 %v2928_v55  ;;  %v545_v36 = vrot.slane %v2928_v55, 6 }
 0x213   :  { %v445_v57 = vpop.permute.xlu1 %444 }
 0x214   :  { %v2931_v58 = vadd.f32 %v445_v57, %v437_v56 }
 0x216   :  { %2512 = vtanh.f32 %v2931_v58  ;;  %v658_v40 = vrot.slane %v2931_v58, 2 }
 0x21c   :  { %v2511_v59 = vpop.eup %2510 }
 0x21d   :  { %346 = vrot.lane.b32.xlu0 %v2511_v59, %s2774_s3 }
 0x220   :  { %v2513_v60 = vpop.eup %2512 }
 0x221   :  { %450 = vrot.lane.b32.xlu1 %v2513_v60, %s2774_s3 }
 0x28f   :  { %v347_v61 = vpop.permute.xlu0 %346 }
 0x290   :  { %v349_v62 = vmul.f32 %v2507_v47, %v347_v61 }
 0x292   :  { %351 = vrot.lane.b32.xlu0 %v349_v62, %s2775_s12 }
 0x293   :  { %v451_v63 = vpop.permute.xlu1 %450 }
 0x294   :  { %v2937_v0 = vmul.f32 %v2509_v50, %v451_v63 }
 0x296   :  { %v571_v1 = vrot.slane %v2937_v0, 6 }
 0x298   :  { %572 = vrot.lane.b32.xlu1 %v571_v1, %s2775_s12 }
 0x304   :  { %v352_v2 = vpop.permute.xlu0 %351 }
 0x305   :  { %355 = vst.msk [vmem:[#allocation8] sm:$0x3] %vm354_vm2, %v352_v2  ;;  %2234 = vmatmul.mubr.msk.f32.vlgmr.msra.gmra.mrb[4].mxu0 %vm251_vm3, %v352_v2 }
 0x306   :  { %2413 = vmatpush3.bf16.msra.mxu0 %v2870_v12  ;;  %2255 = vmatprep.mubr.msk.f32.mxu0 %vm2772_vm1, %v2773_v21 }
 0x307   :  { %2414 = vmatprep.subr.bf16.mxu0 %v2771_v13 }
 0x30a   :  { %v573_v3 = vpop.permute.xlu1 %572  ;;  %2416 = vmatpush3.bf16.msra.mxu0 %v2879_v19 }
 0x30b   :  { %2245 = vmatmul.mubr.msk.f32.vlgmr.msra.gmra.mrb[4].mxu1 %vm251_vm3, %v573_v3  ;;  %2423 = vmatprep.subr.bf16.mxu0 %v2771_v13 }
 0x30c   :  { %2419 = vmatpush3.bf16.msra.mxu1 %v2873_v14  ;;  %2266 = vmatprep.mubr.msk.f32.mxu1 %vm2772_vm1, %v2773_v21 }
 0x30d   :  { %2420 = vmatprep.subr.bf16.mxu1 %v2771_v13 }
 0x310   :  { %2422 = vmatpush3.bf16.msra.mxu1 %v2883_v20 }
 0x311   :  { %2429 = vmatprep.subr.bf16.mxu1 %v2771_v13 }
 0x3d8   :  { %v529_v4 = vpop.f32.mrb[4].mxu0 }
 0x3d9   :  { %v534_v5 = vrot.slane %v529_v4, 6  ;;  %v2235_v6 = vpop.f32.mrb[5].mxu0 }
 0x3db   :  { %v536_v7 = vadd.f32 %v534_v5, %v2918_v30 }
 0x3dd   :  { %2514 = vtanh.f32 %v536_v7  ;;  %v2074_v17 = vmul.f32 -1.442695, %v536_v7 }
 0x3de   :  { %v642_v8 = vpop.f32.mrb[4].mxu1 }
 0x3df   :  { %v647_v9 = vrot.slane %v642_v8, 4  ;;  %v2246_v10 = vpop.f32.mrb[5].mxu1 }
 0x3e1   :  { %v649_v11 = vadd.f32 %v647_v9, %v2921_v35 }
 0x3e3   :  { %2516 = vtanh.f32 %v649_v11  ;;  %v2076_v18 = vmul.f32 -1.442695, %v649_v11 }
 0x3e4   :  { %2518 = vpow2.f32 %v2074_v17 }
 0x3e5   :  { %2520 = vpow2.f32 %v2076_v18 }
 0x3e7   :  { %v2515_v15 = vpop.eup %2514 }
 0x3e8   :  { %549 = vrot.lane.b32.xlu0 %v2515_v15, %s2774_s3 }
 0x3ed   :  { %v2517_v16 = vpop.eup %2516 }
 0x3ee   :  { %662 = vrot.lane.b32.xlu1 %v2517_v16, %s2774_s3  ;;  %v2519_v22 = vpop.eup %2518 }
 0x3ef   :  { %v540_v23 = vadd.f32 1.0, %v2519_v22  ;;  %v2521_v24 = vpop.eup %2520 }
 0x3f0   :  { %v653_v26 = vadd.f32 1.0, %v2521_v24 }
 0x3f1   :  { %2522 = vrcp.f32 %v540_v23 }
 0x3f2   :  { %2524 = vrcp.f32 %v653_v26 }
 0x3fb   :  { %v2523_v27 = vpop.eup %2522 }
 0x3fc   :  { %v2525_v32 = vpop.eup %2524  ;;  %v547_v37 = vmul.f32 %v2523_v27, %v545_v36 }
 0x3fd   :  { %v660_v41 = vmul.f32 %v2525_v32, %v658_v40 }
 0x45a   :  { %v550_v28 = vpop.permute.xlu0 %549 }
 0x45b   :  { %v552_v31 = vmul.f32 %v2523_v27, %v550_v28 }
 0x45d   :  { %554 = vrot.lane.b32.xlu0 %v552_v31, %s2775_s12 }
 0x460   :  { %v663_v33 = vpop.permute.xlu1 %662 }
 0x461   :  { %v665_v34 = vmul.f32 %v2525_v32, %v663_v33 }
 0x463   :  { %667 = vrot.lane.b32.xlu1 %v665_v34, %s2775_s12 }
 0x4cf   :  { %v555_v38 = vpop.permute.xlu0 %554 }
 0x4d0   :  { %v2963_v39 = vadd.f32 %v555_v38, %v547_v37 }
 0x4d2   :  { %2526 = vtanh.f32 %v2963_v39  ;;  %v771_v16 = vrot.slane %v2963_v39, 6 }
 0x4d5   :  { %v668_v42 = vpop.permute.xlu1 %667 }
 0x4d6   :  { %v2967_v43 = vadd.f32 %v668_v42, %v660_v41 }
 0x4d8   :  { %2528 = vtanh.f32 %v2967_v43  ;;  %v884_v23 = vrot.slane %v2967_v43, 2 }
 0x4dc   :  { %v2527_v44 = vpop.eup %2526 }
 0x4dd   :  { %560 = vrot.lane.b32.xlu0 %v2527_v44, %s2774_s3 }
 0x4e2   :  { %v2529_v45 = vpop.eup %2528 }
 0x4e3   :  { %673 = vrot.lane.b32.xlu1 %v2529_v45, %s2774_s3 }
 0x54f   :  { %v561_v46 = vpop.permute.xlu0 %560 }
 0x550   :  { %v2972_v47 = vmul.f32 %v2523_v27, %v561_v46 }
 0x552   :  { %v684_v48 = vrot.slane %v2972_v47, 2 }
 0x554   :  { %685 = vrot.lane.b32.xlu0 %v684_v48, %s2775_s12 }
 0x555   :  { %v674_v49 = vpop.permute.xlu1 %673 }
 0x556   :  { %v2976_v50 = vmul.f32 %v2525_v32, %v674_v49 }
 0x558   :  { %v797_v51 = vrot.slane %v2976_v50, 4 }
 0x55a   :  { %798 = vrot.lane.b32.xlu1 %v797_v51, %s2775_s12 }
 0x5c6   :  { %v686_v52 = vpop.permute.xlu0 %685 }
 0x5c7   :  { %2256 = vmatmul.mubr.msk.f32.vlgmr.msra.gmra.mrb[6].mxu0 %vm251_vm3, %v686_v52 }
 0x5c8   :  { %2425 = vmatpush3.bf16.msra.mxu0 %v2870_v12  ;;  %2277 = vmatprep.mubr.msk.f32.mxu0 %vm2772_vm1, %v2773_v21 }
 0x5c9   :  { %2426 = vmatprep.subr.bf16.mxu0 %v2771_v13 }
 0x5cc   :  { %v799_v53 = vpop.permute.xlu1 %798  ;;  %2428 = vmatpush3.bf16.msra.mxu0 %v2879_v19 }
 0x5cd   :  { %2267 = vmatmul.mubr.msk.f32.vlgmr.msra.gmra.mrb[6].mxu1 %vm251_vm3, %v799_v53  ;;  %2435 = vmatprep.subr.bf16.mxu0 %v2771_v13 }
 0x5ce   :  { %2431 = vmatpush3.bf16.msra.mxu1 %v2873_v14  ;;  %2288 = vmatprep.mubr.msk.f32.mxu1 %vm2772_vm1, %v2773_v21 }
 0x5cf   :  { %2432 = vmatprep.subr.bf16.mxu1 %v2771_v13 }
 0x5d2   :  { %2434 = vmatpush3.bf16.msra.mxu1 %v2883_v20 }
 0x5d3   :  { %2441 = vmatprep.subr.bf16.mxu1 %v2771_v13 }
 0x69a   :  { %v755_v54 = vpop.f32.mrb[6].mxu0 }
 0x69b   :  { %v760_v55 = vrot.slane %v755_v54, 4  ;;  %v2257_v56 = vpop.f32.mrb[7].mxu0 }
 0x69d   :  { %v762_v57 = vadd.f32 %v760_v55, %v2918_v30 }
 0x69f   :  { %2530 = vtanh.f32 %v762_v57  ;;  %v2078_v1 = vmul.f32 -1.442695, %v762_v57 }
 0x6a0   :  { %v868_v58 = vpop.f32.mrb[6].mxu1 }
 0x6a1   :  { %v873_v59 = vrot.slane %v868_v58, 6  ;;  %v2268_v60 = vpop.f32.mrb[7].mxu1 }
 0x6a3   :  { %v875_v61 = vadd.f32 %v873_v59, %v2921_v35 }
 0x6a5   :  { %2532 = vtanh.f32 %v875_v61  ;;  %v2080_v2 = vmul.f32 -1.442695, %v875_v61 }
 0x6a6   :  { %2534 = vpow2.f32 %v2078_v1 }
 0x6a7   :  { %2536 = vpow2.f32 %v2080_v2 }
 0x6a9   :  { %v2531_v62 = vpop.eup %2530 }
 0x6aa   :  { %775 = vrot.lane.b32.xlu0 %v2531_v62, %s2774_s3 }
 0x6af   :  { %v2533_v63 = vpop.eup %2532 }
 0x6b0   :  { %888 = vrot.lane.b32.xlu1 %v2533_v63, %s2774_s3  ;;  %v2535_v3 = vpop.eup %2534 }
 0x6b1   :  { %v766_v4 = vadd.f32 1.0, %v2535_v3  ;;  %v2537_v5 = vpop.eup %2536 }
 0x6b2   :  { %v879_v6 = vadd.f32 1.0, %v2537_v5 }
 0x6b3   :  { %2538 = vrcp.f32 %v766_v4 }
 0x6b4   :  { %2540 = vrcp.f32 %v879_v6 }
 0x6bd   :  { %v2539_v7 = vpop.eup %2538 }
 0x6be   :  { %v2541_v10 = vpop.eup %2540  ;;  %v773_v17 = vmul.f32 %v2539_v7, %v771_v16 }
 0x6bf   :  { %v886_v24 = vmul.f32 %v2541_v10, %v884_v23 }
 0x71c   :  { %v776_v8 = vpop.permute.xlu0 %775 }
 0x71d   :  { %v778_v9 = vmul.f32 %v2539_v7, %v776_v8 }
 0x71f   :  { %780 = vrot.lane.b32.xlu0 %v778_v9, %s2775_s12 }
 0x722   :  { %v889_v11 = vpop.permute.xlu1 %888 }
 0x723   :  { %v891_v15 = vmul.f32 %v2541_v10, %v889_v11 }
 0x725   :  { %893 = vrot.lane.b32.xlu1 %v891_v15, %s2775_s12 }
 0x791   :  { %v781_v18 = vpop.permute.xlu0 %780 }
 0x792   :  { %v3001_v22 = vadd.f32 %v781_v18, %v773_v17 }
 0x794   :  { %2542 = vtanh.f32 %v3001_v22  ;;  %v997_v62 = vrot.slane %v3001_v22, 6 }
 0x797   :  { %v894_v26 = vpop.permute.xlu1 %893 }
 0x798   :  { %v3005_v27 = vadd.f32 %v894_v26, %v886_v24 }
 0x79a   :  { %2544 = vtanh.f32 %v3005_v27  ;;  %v1107_v2 = vrot.slane %v3005_v27, 2 }
 0x79e   :  { %v2543_v28 = vpop.eup %2542 }
 0x79f   :  { %786 = vrot.lane.b32.xlu0 %v2543_v28, %s2774_s3 }
 0x7a4   :  { %v2545_v31 = vpop.eup %2544 }
 0x7a5   :  { %899 = vrot.lane.b32.xlu1 %v2545_v31, %s2774_s3 }
 0x811   :  { %v787_v32 = vpop.permute.xlu0 %786 }
 0x812   :  { %v3010_v33 = vmul.f32 %v2539_v7, %v787_v32 }
 0x814   :  { %v910_v34 = vrot.slane %v3010_v33, 4 }
 0x816   :  { %911 = vrot.lane.b32.xlu0 %v910_v34, %s2775_s12 }
 0x817   :  { %v900_v36 = vpop.permute.xlu1 %899 }
 0x818   :  { %v3014_v37 = vmul.f32 %v2541_v10, %v900_v36 }
 0x81a   :  { %v1023_v38 = vrot.slane %v3014_v37, 2 }
 0x81c   :  { %1024 = vrot.lane.b32.xlu1 %v1023_v38, %s2775_s12 }
 0x888   :  { %v912_v39 = vpop.permute.xlu0 %911 }
 0x889   :  { %2278 = vmatmul.mubr.msk.f32.vlgmr.msra.gmra.mrb[8].mxu0 %vm251_vm3, %v912_v39 }
 0x88a   :  { %2437 = vmatpush3.bf16.msra.mxu0 %v2870_v12  ;;  %2299 = vmatprep.mubr.msk.f32.mxu0 %vm2772_vm1, %v2773_v21 }
 0x88b   :  { %2438 = vmatprep.subr.bf16.mxu0 %v2771_v13 }
 0x88e   :  { %v1025_v40 = vpop.permute.xlu1 %1024  ;;  %2440 = vmatpush3.bf16.msra.mxu0 %v2879_v19 }
 0x88f   :  { %2289 = vmatmul.mubr.msk.f32.vlgmr.msra.gmra.mrb[8].mxu1 %vm251_vm3, %v1025_v40  ;;  %2447 = vmatprep.subr.bf16.mxu0 %v2771_v13 }
 0x890   :  { %2443 = vmatpush3.bf16.msra.mxu1 %v2873_v14  ;;  %2310 = vmatprep.mubr.msk.f32.mxu1 %vm2772_vm1, %v2773_v21 }
 0x891   :  { %2444 = vmatprep.subr.bf16.mxu1 %v2771_v13 }
 0x894   :  { %2446 = vmatpush3.bf16.msra.mxu1 %v2883_v20 }
 0x895   :  { %2453 = vmatprep.subr.bf16.mxu1 %v2771_v13 }
 0x95c   :  { %v981_v41 = vpop.f32.mrb[8].mxu0 }
 0x95d   :  { %v986_v42 = vrot.slane %v981_v41, 2  ;;  %v2279_v43 = vpop.f32.mrb[9].mxu0 }
 0x95f   :  { %v988_v44 = vadd.f32 %v986_v42, %v2918_v30 }
 0x961   :  { %2546 = vtanh.f32 %v988_v44  ;;  %v2082_v52 = vmul.f32 -1.442695, %v988_v44 }
 0x962   :  { %v1094_v45 = vpop.f32.mrb[8].mxu1 }
 0x963   :  { %v1098_v46 = vadd.f32 %v1094_v45, %v2921_v35  ;;  %v2290_v48 = vpop.f32.mrb[9].mxu1 }
 0x965   :  { %2548 = vtanh.f32 %v1098_v46  ;;  %v2084_v53 = vmul.f32 -1.442695, %v1098_v46 }
 0x966   :  { %2550 = vpow2.f32 %v2082_v52 }
 0x967   :  { %2552 = vpow2.f32 %v2084_v53 }
 0x96b   :  { %v2547_v49 = vpop.eup %2546 }
 0x96c   :  { %1001 = vrot.lane.b32.xlu0 %v2547_v49, %s2774_s3 }
 0x96f   :  { %v2549_v51 = vpop.eup %2548 }
 0x970   :  { %1111 = vrot.lane.b32.xlu1 %v2549_v51, %s2774_s3  ;;  %v2551_v54 = vpop.eup %2550 }
 0x971   :  { %v992_v55 = vadd.f32 1.0, %v2551_v54  ;;  %v2553_v56 = vpop.eup %2552 }
 0x972   :  { %v1102_v30 = vadd.f32 1.0, %v2553_v56 }
 0x973   :  { %2554 = vrcp.f32 %v992_v55 }
 0x974   :  { %2556 = vrcp.f32 %v1102_v30 }
 0x97d   :  { %v2555_v57 = vpop.eup %2554 }
 0x97e   :  { %v2557_v59 = vpop.eup %2556  ;;  %v999_v63 = vmul.f32 %v2555_v57, %v997_v62 }
 0x97f   :  { %v1109_v4 = vmul.f32 %v2557_v59, %v1107_v2 }
 0x9de   :  { %v1002_v35 = vpop.permute.xlu0 %1001 }
 0x9df   :  { %v1004_v58 = vmul.f32 %v2555_v57, %v1002_v35 }
 0x9e1   :  { %1006 = vrot.lane.b32.xlu0 %v1004_v58, %s2775_s12 }
 0x9e2   :  { %v1112_v60 = vpop.permute.xlu1 %1111 }
 0x9e3   :  { %v1114_v61 = vmul.f32 %v2557_v59, %v1112_v60 }
 0x9e5   :  { %1116 = vrot.lane.b32.xlu1 %v1114_v61, %s2775_s12 }
 0xa53   :  { %v1007_v1 = vpop.permute.xlu0 %1006 }
 0xa54   :  { %v3040_v3 = vadd.f32 %v1007_v1, %v999_v63 }
 0xa56   :  { %2558 = vtanh.f32 %v3040_v3  ;;  %v1217_v51 = vrot.slane %v3040_v3, 6 }
 0xa57   :  { %v1117_v5 = vpop.permute.xlu1 %1116 }
 0xa58   :  { %v3043_v6 = vadd.f32 %v1117_v5, %v1109_v4 }
 0xa5a   :  { %2560 = vtanh.f32 %v3043_v6  ;;  %v1327_v54 = vrot.slane %v3043_v6, 2 }
 0xa60   :  { %v2559_v7 = vpop.eup %2558 }
 0xa61   :  { %1012 = vrot.lane.b32.xlu0 %v2559_v7, %s2774_s3 }
 0xa64   :  { %v2561_v8 = vpop.eup %2560 }
 0xa65   :  { %1122 = vrot.lane.b32.xlu1 %v2561_v8, %s2774_s3 }
 0xad3   :  { %v1013_v9 = vpop.permute.xlu0 %1012 }
 0xad4   :  { %v3048_v10 = vmul.f32 %v2555_v57, %v1013_v9 }
 0xad6   :  { %v1133_v11 = vrot.slane %v3048_v10, 6 }
 0xad7   :  { %v1123_v15 = vpop.permute.xlu1 %1122 }
 0xad8   :  { %v3051_v16 = vmul.f32 %v2557_v59, %v1123_v15  ;;  %1134 = vrot.lane.b32.xlu1 %v1133_v11, %s2775_s12 }
 0xada   :  { %1241 = vrot.lane.b32.xlu0 %v3051_v16, %s2775_s12 }
 0xb4a   :  { %v1135_v17 = vpop.permute.xlu1 %1134 }
 0xb4b   :  { %2300 = vmatmul.mubr.msk.f32.vlgmr.msra.gmra.mrb[10].mxu0 %vm251_vm3, %v1135_v17 }
 0xb4c   :  { %v1242_v18 = vpop.permute.xlu0 %1241  ;;  %2449 = vmatpush3.bf16.msra.mxu0 %v2870_v12  ;;  %2321 = vmatprep.mubr.msk.f32.mxu0 %vm2772_vm1, %v2773_v21 }
 0xb4d   :  { %2311 = vmatmul.mubr.msk.f32.vlgmr.msra.gmra.mrb[10].mxu1 %vm251_vm3, %v1242_v18  ;;  %2450 = vmatprep.subr.bf16.mxu0 %v2771_v13 }
 0xb4e   :  { %2455 = vmatpush3.bf16.msra.mxu1 %v2873_v14  ;;  %2332 = vmatprep.mubr.msk.f32.mxu1 %vm2772_vm1, %v2773_v21 }
 0xb4f   :  { %2456 = vmatprep.subr.bf16.mxu1 %v2771_v13 }
 0xb50   :  { %2452 = vmatpush3.bf16.msra.mxu0 %v2879_v19 }
 0xb51   :  { %2459 = vmatprep.subr.bf16.mxu0 %v2771_v13 }
 0xb52   :  { %2458 = vmatpush3.bf16.msra.mxu1 %v2883_v20 }
 0xb53   :  { %2465 = vmatprep.subr.bf16.mxu1 %v2771_v13 }
 0xc1e   :  { %v1204_v22 = vpop.f32.mrb[10].mxu0 }
 0xc1f   :  { %v1208_v23 = vadd.f32 %v1204_v22, %v2914_v25  ;;  %v2301_v24 = vpop.f32.mrb[11].mxu0 }
 0xc20   :  { %v1311_v26 = vpop.f32.mrb[10].mxu1 }
 0xc21   :  { %2562 = vtanh.f32 %v1208_v23  ;;  %v1316_v27 = vrot.slane %v1311_v26, 2  ;;  %v2312_v28 = vpop.f32.mrb[11].mxu1  ;;  %v2086_v36 = vmul.f32 -1.442695, %v1208_v23 }
 0xc23   :  { %v1318_v31 = vadd.f32 %v1316_v27, %v2916_v29 }
 0xc25   :  { %2564 = vtanh.f32 %v1318_v31  ;;  %v2088_v38 = vmul.f32 -1.442695, %v1318_v31 }
 0xc26   :  { %2566 = vpow2.f32 %v2086_v36 }
 0xc27   :  { %2568 = vpow2.f32 %v2088_v38 }
 0xc2b   :  { %v2563_v32 = vpop.eup %2562 }
 0xc2c   :  { %1221 = vrot.lane.b32.xlu0 %v2563_v32, %s2774_s3 }
 0xc2f   :  { %v2565_v34 = vpop.eup %2564 }
 0xc30   :  { %1331 = vrot.lane.b32.xlu1 %v2565_v34, %s2774_s3  ;;  %v2567_v39 = vpop.eup %2566 }
 0xc31   :  { %v1212_v40 = vadd.f32 1.0, %v2567_v39  ;;  %v2569_v41 = vpop.eup %2568 }
 0xc32   :  { %v1322_v42 = vadd.f32 1.0, %v2569_v41 }
 0xc33   :  { %2570 = vrcp.f32 %v1212_v40 }
 0xc34   :  { %2572 = vrcp.f32 %v1322_v42 }
 0xc3d   :  { %v2571_v43 = vpop.eup %2570 }
 0xc3e   :  { %v2573_v46 = vpop.eup %2572  ;;  %v1219_v52 = vmul.f32 %v2571_v43, %v1217_v51 }
 0xc3f   :  { %v1329_v56 = vmul.f32 %v2573_v46, %v1327_v54 }
 0xc9e   :  { %v1222_v44 = vpop.permute.xlu0 %1221 }
 0xc9f   :  { %v1224_v45 = vmul.f32 %v2571_v43, %v1222_v44 }
 0xca1   :  { %1226 = vrot.lane.b32.xlu0 %v1224_v45, %s2775_s12 }
 0xca2   :  { %v1332_v48 = vpop.permute.xlu1 %1331 }
 0xca3   :  { %v1334_v49 = vmul.f32 %v2573_v46, %v1332_v48 }
 0xca5   :  { %1336 = vrot.lane.b32.xlu1 %v1334_v49, %s2775_s12 }
 0xd13   :  { %v1227_v53 = vpop.permute.xlu0 %1226 }
 0xd14   :  { %v3078_v55 = vadd.f32 %v1227_v53, %v1219_v52 }
 0xd16   :  { %2574 = vtanh.f32 %v3078_v55  ;;  %v1435_v39 = vrot.slane %v3078_v55, 6 }
 0xd17   :  { %v1337_v30 = vpop.permute.xlu1 %1336 }
 0xd18   :  { %v3081_v57 = vadd.f32 %v1337_v30, %v1329_v56 }
 0xd1a   :  { %2576 = vtanh.f32 %v3081_v57 }
 0xd20   :  { %v2575_v35 = vpop.eup %2574 }
 0xd21   :  { %1232 = vrot.lane.b32.xlu0 %v2575_v35, %s2774_s3 }
 0xd24   :  { %v2577_v58 = vpop.eup %2576 }
 0xd25   :  { %1342 = vrot.lane.b32.xlu1 %v2577_v58, %s2774_s3 }
 0xd93   :  { %v1233_v59 = vpop.permute.xlu0 %1232 }
 0xd94   :  { %v1235_v60 = vmul.f32 %v2571_v43, %v1233_v59  ;;  %v1546_v43 = vrot.slane %v3081_v57, 2 }
 0xd96   :  { %1237 = vrot.lane.b32.xlu0 %v1235_v60, %s2775_s12 }
 0xd97   :  { %v1343_v61 = vpop.permute.xlu1 %1342 }
 0xd98   :  { %v3087_v62 = vmul.f32 %v2573_v46, %v1343_v61 }
 0xd9a   :  { %v1459_v63 = vrot.slane %v3087_v62, 6 }
 0xd9c   :  { %1460 = vrot.lane.b32.xlu1 %v1459_v63, %s2775_s12 }
 0xe08   :  { %v3091_v1 = vpop.permute.xlu0 %1237 }
 0xe09   :  { %2322 = vmatmul.mubr.msk.f32.vlgmr.msra.gmra.mrb[12].mxu0 %vm251_vm3, %v3091_v1 }
 0xe0a   :  { %2461 = vmatpush3.bf16.msra.mxu0 %v2870_v12  ;;  %2343 = vmatprep.mubr.msk.f32.mxu0 %vm2772_vm1, %v2773_v21 }
 0xe0b   :  { %2462 = vmatprep.subr.bf16.mxu0 %v2771_v13 }
 0xe0e   :  { %v1461_v2 = vpop.permute.xlu1 %1460  ;;  %2464 = vmatpush3.bf16.msra.mxu0 %v2879_v19 }
 0xe0f   :  { %2333 = vmatmul.mubr.msk.f32.vlgmr.msra.gmra.mrb[12].mxu1 %vm251_vm3, %v1461_v2  ;;  %2471 = vmatprep.subr.bf16.mxu0 %v2771_v13 }
 0xe10   :  { %2467 = vmatpush3.bf16.msra.mxu1 %v2873_v14  ;;  %2354 = vmatprep.mubr.msk.f32.mxu1 %vm2772_vm1, %v2773_v21 }
 0xe11   :  { %2468 = vmatprep.subr.bf16.mxu1 %v2771_v13 }
 0xe14   :  { %2470 = vmatpush3.bf16.msra.mxu1 %v2883_v20 }
 0xe15   :  { %2477 = vmatprep.subr.bf16.mxu1 %v2771_v13 }
 0xedc   :  { %v1419_v3 = vpop.f32.mrb[12].mxu0 }
 0xedd   :  { %v1424_v4 = vrot.slane %v1419_v3, 6  ;;  %v2323_v5 = vpop.f32.mrb[13].mxu0 }
 0xedf   :  { %v1426_v6 = vadd.f32 %v1424_v4, %v2914_v25 }
 0xee1   :  { %2578 = vtanh.f32 %v1426_v6  ;;  %v2090_v18 = vmul.f32 -1.442695, %v1426_v6 }
 0xee2   :  { %v1530_v7 = vpop.f32.mrb[12].mxu1 }
 0xee3   :  { %v1535_v8 = vrot.slane %v1530_v7, 4  ;;  %v2334_v9 = vpop.f32.mrb[13].mxu1 }
 0xee5   :  { %v1537_v11 = vadd.f32 %v1535_v8, %v2916_v29 }
 0xee7   :  { %2580 = vtanh.f32 %v1537_v11  ;;  %v2092_v22 = vmul.f32 -1.442695, %v1537_v11 }
 0xee8   :  { %2582 = vpow2.f32 %v2090_v18 }
 0xee9   :  { %2584 = vpow2.f32 %v2092_v22 }
 0xeeb   :  { %v2579_v15 = vpop.eup %2578 }
 0xeec   :  { %1439 = vrot.lane.b32.xlu0 %v2579_v15, %s2774_s3 }
 0xef1   :  { %v2581_v17 = vpop.eup %2580 }
 0xef2   :  { %1550 = vrot.lane.b32.xlu1 %v2581_v17, %s2774_s3  ;;  %v2583_v23 = vpop.eup %2582 }
 0xef3   :  { %v1430_v24 = vadd.f32 1.0, %v2583_v23  ;;  %v2585_v26 = vpop.eup %2584 }
 0xef4   :  { %v1541_v27 = vadd.f32 1.0, %v2585_v26 }
 0xef5   :  { %2586 = vrcp.f32 %v1430_v24 }
 0xef6   :  { %2588 = vrcp.f32 %v1541_v27 }
 0xeff   :  { %v2587_v28 = vpop.eup %2586 }
 0xf00   :  { %v2589_v34 = vpop.eup %2588  ;;  %v1437_v40 = vmul.f32 %v2587_v28, %v1435_v39 }
 0xf01   :  { %v1548_v44 = vmul.f32 %v2589_v34, %v1546_v43 }
 0xf5e   :  { %v1440_v31 = vpop.permute.xlu0 %1439 }
 0xf5f   :  { %v1442_v32 = vmul.f32 %v2587_v28, %v1440_v31 }
 0xf61   :  { %1444 = vrot.lane.b32.xlu0 %v1442_v32, %s2775_s12 }
 0xf64   :  { %v1551_v36 = vpop.permute.xlu1 %1550 }
 0xf65   :  { %v1553_v38 = vmul.f32 %v2589_v34, %v1551_v36 }
 0xf67   :  { %1555 = vrot.lane.b32.xlu1 %v1553_v38, %s2775_s12 }
 0xfd3   :  { %v1445_v41 = vpop.permute.xlu0 %1444 }
 0xfd4   :  { %v3115_v42 = vadd.f32 %v1445_v41, %v1437_v40 }
 0xfd6   :  { %2590 = vtanh.f32 %v3115_v42  ;;  %v1657_v17 = vrot.slane %v3115_v42, 6 }
 0xfd9   :  { %v1556_v45 = vpop.permute.xlu1 %1555 }
 0xfda   :  { %v3119_v46 = vadd.f32 %v1556_v45, %v1548_v44 }
 0xfdc   :  { %2592 = vtanh.f32 %v3119_v46  ;;  %v1768_v24 = vrot.slane %v3119_v46, 2 }
 0xfe0   :  { %v2591_v48 = vpop.eup %2590 }
 0xfe1   :  { %1450 = vrot.lane.b32.xlu0 %v2591_v48, %s2774_s3 }
 0xfe6   :  { %v2593_v49 = vpop.eup %2592 }
 0xfe7   :  { %1561 = vrot.lane.b32.xlu1 %v2593_v49, %s2774_s3 }
0x1053   :  { %v1451_v51 = vpop.permute.xlu0 %1450 }
0x1054   :  { %v3124_v52 = vmul.f32 %v2587_v28, %v1451_v51 }
0x1056   :  { %v1570_v53 = vrot.slane %v3124_v52, 2 }
0x1058   :  { %1571 = vrot.lane.b32.xlu0 %v1570_v53, %s2775_s12 }
0x1059   :  { %v1562_v54 = vpop.permute.xlu1 %1561 }
0x105a   :  { %v3128_v55 = vmul.f32 %v2589_v34, %v1562_v54 }
0x105c   :  { %v1681_v56 = vrot.slane %v3128_v55, 4 }
0x105e   :  { %1682 = vrot.lane.b32.xlu1 %v1681_v56, %s2775_s12 }
0x10ca   :  { %v1572_v30 = vpop.permute.xlu0 %1571 }
0x10cb   :  { %2344 = vmatmul.mubr.msk.f32.vlgmr.msra.gmra.mrb[14].mxu0 %vm251_vm3, %v1572_v30 }
0x10cc   :  { %2473 = vmatpush3.bf16.msra.mxu0 %v2870_v12  ;;  %2365 = vmatprep.mubr.msk.f32.mxu0 %vm2772_vm1, %v2773_v21 }
0x10cd   :  { %2474 = vmatprep.subr.bf16.mxu0 %v2771_v13 }
0x10d0   :  { %v1683_v57 = vpop.permute.xlu1 %1682  ;;  %2476 = vmatpush3.bf16.msra.mxu0 %v2879_v19 }
0x10d1   :  { %2355 = vmatmul.mubr.msk.f32.vlgmr.msra.gmra.mrb[14].mxu1 %vm251_vm3, %v1683_v57 }
0x10d2   :  { %2479 = vmatpush3.bf16.msra.mxu1 %v2873_v14  ;;  %2376 = vmatprep.mubr.msk.f32.mxu1 %vm2772_vm1, %v2773_v21 }
0x10d3   :  { %2480 = vmatprep.subr.bf16.mxu1 %v2771_v13 }
0x10d6   :  { %2482 = vmatpush3.bf16.msra.mxu1 %v2883_v20 }
0x119e   :  { %v1641_v12 = vpop.f32.mrb[14].mxu0 }
0x119f   :  { %v1646_v35 = vrot.slane %v1641_v12, 4  ;;  %v2345_v58 = vpop.f32.mrb[15].mxu0 }
0x11a1   :  { %v1648_v59 = vadd.f32 %v1646_v35, %v2914_v25 }
0x11a3   :  { %2594 = vtanh.f32 %v1648_v59  ;;  %v2094_v13 = vmul.f32 -1.442695, %v1648_v59 }
0x11a4   :  { %v1752_v60 = vpop.f32.mrb[14].mxu1 }
0x11a5   :  { %v1757_v61 = vrot.slane %v1752_v60, 6  ;;  %v2356_v19 = vpop.f32.mrb[15].mxu1 }
0x11a7   :  { %v1759_v63 = vadd.f32 %v1757_v61, %v2916_v29 }
0x11a9   :  { %2596 = vtanh.f32 %v1759_v63  ;;  %v2096_v20 = vmul.f32 -1.442695, %v1759_v63 }
0x11aa   :  { %2598 = vpow2.f32 %v2094_v13 }
0x11ab   :  { %2600 = vpow2.f32 %v2096_v20 }
0x11ad   :  { %v2595_v14 = vpop.eup %2594 }
0x11ae   :  { %1661 = vrot.lane.b32.xlu0 %v2595_v14, %s2774_s3 }
0x11b3   :  { %v2597_v21 = vpop.eup %2596 }
0x11b4   :  { %1772 = vrot.lane.b32.xlu1 %v2597_v21, %s2774_s3  ;;  %v2599_v2 = vpop.eup %2598 }
0x11b5   :  { %v1652_v3 = vadd.f32 1.0, %v2599_v2  ;;  %v2601_v4 = vpop.eup %2600 }
0x11b6   :  { %v1763_v5 = vadd.f32 1.0, %v2601_v4 }
0x11b7   :  { %2602 = vrcp.f32 %v1652_v3 }
0x11b8   :  { %2604 = vrcp.f32 %v1763_v5 }
0x11c1   :  { %v2603_v6 = vpop.eup %2602 }
0x11c2   :  { %v2605_v9 = vpop.eup %2604  ;;  %v1659_v18 = vmul.f32 %v2603_v6, %v1657_v17 }
0x11c3   :  { %v1770_v26 = vmul.f32 %v2605_v9, %v1768_v24 }
0x1220   :  { %v1662_v7 = vpop.permute.xlu0 %1661 }
0x1221   :  { %v1664_v8 = vmul.f32 %v2603_v6, %v1662_v7 }
0x1223   :  { %1666 = vrot.lane.b32.xlu0 %v1664_v8, %s2775_s12 }
0x1226   :  { %v1773_v11 = vpop.permute.xlu1 %1772 }
0x1227   :  { %v1775_v15 = vmul.f32 %v2605_v9, %v1773_v11 }
0x1229   :  { %1777 = vrot.lane.b32.xlu1 %v1775_v15, %s2775_s12 }
0x1295   :  { %v1667_v22 = vpop.permute.xlu0 %1666 }
0x1296   :  { %v1669_v23 = vadd.f32 %v1667_v22, %v1659_v18 }
0x1298   :  { %2606 = vtanh.f32 %v1669_v23  ;;  %v1879_v14 = vrot.slane %v1669_v23, 6 }
0x129b   :  { %v1778_v27 = vpop.permute.xlu1 %1777 }
0x129c   :  { %v1780_v28 = vadd.f32 %v1778_v27, %v1770_v26 }
0x129e   :  { %2608 = vtanh.f32 %v1780_v28  ;;  %v1987_v20 = vrot.slane %v1780_v28, 2 }
0x12a2   :  { %v2607_v31 = vpop.eup %2606 }
0x12a3   :  { %1672 = vrot.lane.b32.xlu0 %v2607_v31, %s2774_s3 }
0x12a8   :  { %v2609_v32 = vpop.eup %2608 }
0x12a9   :  { %1783 = vrot.lane.b32.xlu1 %v2609_v32, %s2774_s3 }
0x1315   :  { %v1673_v34 = vpop.permute.xlu0 %1672 }
0x1316   :  { %v3154_v36 = vmul.f32 %v2603_v6, %v1673_v34 }
0x1318   :  { %v1792_v38 = vrot.slane %v3154_v36, 4 }
0x131a   :  { %1793 = vrot.lane.b32.xlu0 %v1792_v38, %s2775_s12 }
0x131b   :  { %v1784_v39 = vpop.permute.xlu1 %1783 }
0x131c   :  { %v3158_v40 = vmul.f32 %v2605_v9, %v1784_v39 }
0x131e   :  { %v1903_v41 = vrot.slane %v3158_v40, 2 }
0x1320   :  { %1904 = vrot.lane.b32.xlu1 %v1903_v41, %s2775_s12 }
0x138c   :  { %v1794_v42 = vpop.permute.xlu0 %1793 }
0x138d   :  { %2366 = vmatmul.mubr.msk.f32.vlgmr.msra.gmra.mrb[16].mxu0 %vm251_vm3, %v1794_v42 }
0x1392   :  { %v1905_v43 = vpop.permute.xlu1 %1904 }
0x1393   :  { %2377 = vmatmul.mubr.msk.f32.vlgmr.msra.gmra.mrb[16].mxu1 %vm251_vm3, %v1905_v43 }
0x1460   :  { %v1863_v44 = vpop.f32.mrb[16].mxu0 }
0x1461   :  { %v1868_v45 = vrot.slane %v1863_v44, 2  ;;  %v2367_v46 = vpop.f32.mrb[17].mxu0 }
0x1463   :  { %v1870_v48 = vadd.f32 %v1868_v45, %v2914_v25 }
0x1465   :  { %2610 = vtanh.f32 %v1870_v48  ;;  %v2098_v30 = vmul.f32 -1.442695, %v1870_v48 }
0x1466   :  { %v1974_v49 = vpop.f32.mrb[16].mxu1 }
0x1467   :  { %v1978_v51 = vadd.f32 %v1974_v49, %v2916_v29  ;;  %v2378_v53 = vpop.f32.mrb[17].mxu1 }
0x1469   :  { %2612 = vtanh.f32 %v1978_v51  ;;  %v2100_v57 = vmul.f32 -1.442695, %v1978_v51 }
0x146a   :  { %2614 = vpow2.f32 %v2098_v30 }
0x146b   :  { %2616 = vpow2.f32 %v2100_v57 }
0x146f   :  { %v2611_v54 = vpop.eup %2610 }
0x1470   :  { %1883 = vrot.lane.b32.xlu0 %v2611_v54, %s2774_s3 }
0x1473   :  { %v2613_v56 = vpop.eup %2612 }
0x1474   :  { %1991 = vrot.lane.b32.xlu1 %v2613_v56, %s2774_s3  ;;  %v2615_v12 = vpop.eup %2614 }
0x1475   :  { %v1874_v35 = vadd.f32 1.0, %v2615_v12  ;;  %v2617_v58 = vpop.eup %2616 }
0x1476   :  { %v1982_v25 = vadd.f32 1.0, %v2617_v58 }
0x1477   :  { %2618 = vrcp.f32 %v1874_v35 }
0x1478   :  { %2620 = vrcp.f32 %v1982_v25 }
0x1481   :  { %v2619_v59 = vpop.eup %2618 }
0x1482   :  { %v2621_v61 = vpop.eup %2620  ;;  %v1881_v21 = vmul.f32 %v2619_v59, %v1879_v14 }
0x1483   :  { %v1989_v3 = vmul.f32 %v2621_v61, %v1987_v20 }
0x14e2   :  { %v1884_v29 = vpop.permute.xlu0 %1883 }
0x14e3   :  { %v1886_v60 = vmul.f32 %v2619_v59, %v1884_v29 }
0x14e5   :  { %1888 = vrot.lane.b32.xlu0 %v1886_v60, %s2775_s12 }
0x14e6   :  { %v1992_v19 = vpop.permute.xlu1 %1991 }
0x14e7   :  { %v1994_v63 = vmul.f32 %v2621_v61, %v1992_v19 }
0x14e9   :  { %1996 = vrot.lane.b32.xlu1 %v1994_v63, %s2775_s12 }
0x1557   :  { %v1889_v13 = vpop.permute.xlu0 %1888 }
0x1558   :  { %v1891_v2 = vadd.f32 %v1889_v13, %v1881_v21 }
0x155a   :  { %2622 = vtanh.f32 %v1891_v2 }
0x155b   :  { %v1997_v4 = vpop.permute.xlu1 %1996 }
0x155c   :  { %v1999_v5 = vadd.f32 %v1997_v4, %v1989_v3 }
0x155e   :  { %2624 = vtanh.f32 %v1999_v5 }
0x1564   :  { %v2623_v6 = vpop.eup %2622 }
0x1565   :  { %1894 = vrot.lane.b32.xlu0 %v2623_v6, %s2774_s3 }
0x1568   :  { %v2625_v7 = vpop.eup %2624 }
0x1569   :  { %2002 = vrot.lane.b32.xlu1 %v2625_v7, %s2774_s3  ;;  %565 = vrot.lane.b32.xlu0 %v2972_v47, %s2775_s12 }
0x156d   :  { %455 = vrot.lane.b32.xlu1 %v2937_v0, %s2774_s3  ;;  %791 = vrot.lane.b32.xlu0 %v3010_v33, %s2775_s12 }
0x1571   :  { %678 = vrot.lane.b32.xlu1 %v2976_v50, %s2774_s3  ;;  %1017 = vrot.lane.b32.xlu0 %v3048_v10, %s2775_s12 }
0x1575   :  { %904 = vrot.lane.b32.xlu1 %v3014_v37, %s2774_s3  ;;  %1347 = vrot.lane.b32.xlu0 %v3087_v62, %s2774_s3 }
0x1579   :  { %1127 = vrot.lane.b32.xlu1 %v3051_v16, %s2774_s3  ;;  %1566 = vrot.lane.b32.xlu0 %v3128_v55, %s2774_s3 }
0x157d   :  { %2014 = vrot.lane.b32.xlu1 %v1891_v2, %s2776_s13 }
0x1581   :  { %1455 = vrot.lane.b32.xlu1 %v3124_v52, %s2775_s12 }
0x1585   :  { %1677 = vrot.lane.b32.xlu1 %v3154_v36, %s2775_s12 }
0x15d7   :  { %v1895_v0 = vpop.permute.xlu0 %1894 }
0x15d8   :  { %v1897_v47 = vmul.f32 %v2619_v59, %v1895_v0 }
0x15da   :  { %1899 = vrot.lane.b32.xlu0 %v1897_v47, %s2775_s12 }
0x15db   :  { %v2003_v50 = vpop.permute.xlu1 %2002  ;;  %v566_v33 = vpop.permute.xlu0 %565 }
0x15dc   :  { %v2005_v37 = vmul.f32 %v2621_v61, %v2003_v50  ;;  %570 = vst.msk [vmem:[#allocation8] sm:$0xc] %vm569_vm4, %v566_v33 }
0x15de   :  { %2007 = vrot.lane.b32.xlu0 %v2005_v37, %s2774_s3 }
0x15df   :  { %v456_v10 = vpop.permute.xlu1 %455  ;;  %v792_v16 = vpop.permute.xlu0 %791 }
0x15e0   :  { %460 = vst.msk [vmem:[#allocation8 + $0x8] sm:$0xc0] %vm459_vm5, %v456_v10 }
0x15e1   :  { %796 = vst.msk [vmem:[#allocation8] sm:$0x30] %vm795_vm6, %v792_v16 }
0x15e2   :  { %1788 = vrot.lane.b32.xlu0 %v3158_v40, %s2774_s3 }
0x15e3   :  { %v679_v62 = vpop.permute.xlu1 %678  ;;  %v1018_v52 = vpop.permute.xlu0 %1017 }
0x15e4   :  { %683 = vst.msk [vmem:[#allocation8 + $0x8] sm:$0x30] %vm682_vm7, %v679_v62 }
0x15e5   :  { %1022 = vst.msk [vmem:[#allocation8] sm:$0xc0] %vm1021_vm8, %v1018_v52 }
0x15e7   :  { %v905_v55 = vpop.permute.xlu1 %904  ;;  %v1348_v8 = vpop.permute.xlu0 %1347 }
0x15e8   :  { %909 = vst.msk [vmem:[#allocation8 + $0x8] sm:$0xc] %vm908_vm9, %v905_v55 }
0x15e9   :  { %1350 = vst.msk [vmem:[#allocation8] sm:$0xc0] %vm459_vm5, %v1348_v8 }
0x15eb   :  { %v1128_v9 = vpop.permute.xlu1 %1127  ;;  %v1567_v11 = vpop.permute.xlu0 %1566 }
0x15ec   :  { %1132 = vst.msk [vmem:[#allocation8 + $0x8] sm:$0x3] %vm1131_vm10, %v1128_v9 }
0x15ed   :  { %1569 = vst.msk [vmem:[#allocation8] sm:$0x30] %vm682_vm7, %v1567_v11 }
0x15ee   :  { %1240 = vst.msk [vmem:[#allocation8 + $0x8] sm:$0x3] %vm354_vm2, %v3091_v1 }
0x15ef   :  { %v2015_v15 = vpop.permute.xlu1 %2014 }
0x15f0   :  { %2017 = vst.msk [vmem:[#allocation11 - $0x6] sm:$0xc0] %vm1021_vm8, %v2015_v15 }
0x15f1   :  { %2018 = vst.msk [vmem:[#allocation11] sm:$0x3] %vm1131_vm10, %v1999_v5 }
0x15f3   :  { %v1456_v17 = vpop.permute.xlu1 %1455 }
0x15f4   :  { %1458 = vst.msk [vmem:[#allocation8 + $0x8] sm:$0xc] %vm569_vm4, %v1456_v17 }
0x15f7   :  { %v1678_v18 = vpop.permute.xlu1 %1677 }
0x15f8   :  { %1680 = vst.msk [vmem:[#allocation8 + $0x8] sm:$0x30] %vm795_vm6, %v1678_v18 }
0x164c   :  { %v1900_v22 = vpop.permute.xlu0 %1899 }
0x164d   :  { %1902 = vst.msk [vmem:[#allocation8 + $0x8] sm:$0xc0] %vm1021_vm8, %v1900_v22  ;;  %2011 = vst.msk [vmem:[#allocation9 - $0x6] sm:$0xc0] %vm1021_vm8, %v1900_v22 }
0x1650   :  { %v2008_v1 = vpop.permute.xlu0 %2007 }
0x1651   :  { %2010 = vst.msk [vmem:[#allocation8] sm:$0x3] %vm1131_vm10, %v2008_v1  ;;  %2012 = vst.msk [vmem:[#allocation9] sm:$0x3] %vm1131_vm10, %v2008_v1 }
0x1652   :  { %2703 = shalt.err (!%p2700_p0)
}
0x1653   :  { %s2704_s22 = scalar_lea.hbm %s3275_s5, 32 }
0x1654   :  { %p2705_p1 = scmp.ne.s32.totalorder %s3275_s5, %s2704_s22  ;;  %p2708_p2 = scmp.lt.u32.totalorder %s2704_s22, %s3275_s5 }
0x1656   :  { %p2710_p3 = pnand %p2708_p2, %p2705_p1 }
0x1658   :  { %2713 = shalt.err (!%p2710_p3)
}
0x1659   :  { %2040 = dma.vmem_to_hbm [thread:$0]  %s2038_s15, 32, %s3275_s5, [#allocation10]  }
0x165a   :  { %s2714_s30 = scalar_lea.vmem %s3215_s17, 32  ;;  %p2719_p5 = scmp.lt.s32.totalorder %s3215_s17, %s3215_s17 }
0x165b   :  { %p2715_p4 = scmp.ne.s32.totalorder %s3215_s17, %s2714_s30  ;;  %p2720_p6 = scmp.lt.s32.totalorder %s2714_s30, %s2714_s30 }
0x165d   :  { %p2721_p7 = por %p2720_p6, %p2719_p5 }
0x165f   :  { %p2722_p8 = pnand %p2721_p7, %p2715_p4 }
0x1661   :  { %2725 = shalt.err (!%p2722_p8)
}
0x1662   :  { %s2726_s0 = scalar_lea.hbm %s3276_s6, 32 }
0x1663   :  { %p2727_p9 = scmp.ne.s32.totalorder %s3276_s6, %s2726_s0  ;;  %p2730_p10 = scmp.lt.u32.totalorder %s2726_s0, %s3276_s6 }
0x1665   :  { %p2732_p11 = pnand %p2730_p10, %p2727_p9 }
0x1667   :  { %2735 = shalt.err (!%p2732_p11)
}
0x1668   :  { %2050 = dma.vmem_to_hbm [thread:$0]  %s3215_s17, 32, %s3276_s6, [#allocation10]   ;;  %v1789_v23 = vpop.permute.xlu0 %1788 }
0x1669   :  { %1791 = vst.msk [vmem:[#allocation8] sm:$0xc] %vm908_vm9, %v1789_v23  ;;  %s2736_s3 = scalar_lea.vmem %s3219_s19, 256  ;;  %p2741_p13 = scmp.lt.s32.totalorder %s3219_s19, %s3219_s19 }
0x166a   :  { %p2737_p12 = scmp.ne.s32.totalorder %s3219_s19, %s2736_s3  ;;  %p2742_p0 = scmp.lt.s32.totalorder %s2736_s3, %s2736_s3 }
0x166c   :  { %p2743_p1 = por %p2742_p0, %p2741_p13 }
0x166e   :  { %p2744_p2 = pnand %p2743_p1, %p2737_p12 }
0x1670   :  { %2747 = shalt.err (!%p2744_p2)
}
0x1671   :  { %s2748_s15 = scalar_lea.hbm %s3274_s4, 256 }
0x1672   :  { %p2749_p3 = scmp.ne.s32.totalorder %s3274_s4, %s2748_s15  ;;  %p2752_p4 = scmp.lt.u32.totalorder %s2748_s15, %s3274_s4 }
0x1674   :  { %p2754_p5 = pnand %p2752_p4, %p2749_p3 }
0x1676   :  { %2757 = shalt.err (!%p2754_p5)
}
0x1677   :  { %s2780_s20 = smov 2  }
0x1678   :  { %2030 = dma.vmem_to_hbm [thread:$0]  %s3219_s19, 256, %s3274_s4, [#allocation4], %s2775_s12, %s2775_s12, %s2780_s20  }
0x1679   :  { %2762 = dma.done.wait [#allocation4], 256  }
0x167a   :  { %2763 = vsyncadd [#allocation4], 4294967040 }
0x167b   :  { %2764 = dma.done.wait [#allocation10], 64  }
0x167c   :  { %2765 = vsyncadd [#allocation10], 4294967232 }
0x167d   :  { %2060 = vsyncpa [#allocation3], 1 }
0x167e   :  { %2061 = vsyncpa [#allocation6], 1 }
0x167f   :  { %2062 = vsyncpa [#allocation4], 1 }
0x1680   :  { %2063 = vsyncpa [#allocation10], 1 }

</bundles_post_ra>
